<compile_context>
chip_gen: v5e
topology: v5e:2x2
jax: 0.10.0
libtpu: 0.0.40
codegen_flags: <defaults>
</compile_context>

<pallas_src>
import jax
import jax.numpy as jnp
from jax import lax
from jax.experimental import pallas as pl
from jax.experimental.pallas import tpu as pltpu

D_FEAT = 2560        # teacher feature dim
D_BOT = 128          # adapter bottleneck dim
N_CLS = 10           # classifier outputs
N_CLS_PAD = 128      # pad classifier out-dim to a full lane width
D_CHUNK = 512        # D_FEAT chunk for the up-proj / classifier loop
N_CHUNK = D_FEAT // D_CHUNK   # 5


def _round_up(x, m):
    return (x + m - 1) // m * m


def _cdiv(a, b):
    return -(-a // b)


def _choose_tile(B, tm):
    """Batch tile: large by default; shrink (multiple of 16) for small batches
    and keep >= 2 grid steps whenever B allows so both v7x TCs are used."""
    if B <= 16:
        return _round_up(B, 8)
    return min(tm, _round_up(_cdiv(B, 2), 16))


def _vmem_limit_bytes(tm_eff):
    """Working-set-derived VMEM request (double-buffered I/O + resident weights
    + live temporaries) with headroom; capped to fit v7x's 64 MiB per TC."""
    feat = 2 * tm_eff * D_FEAT * 4                          # 2-buffered f32 feature tiles
    outb = 2 * tm_eff * N_CLS_PAD * 4                       # 2-buffered f32 logit tiles
    wts = 2 * 2 * (D_FEAT * D_BOT + D_BOT * D_FEAT + D_FEAT * N_CLS_PAD)  # bf16, 2-buf
    bias = 2 * 4 * (D_BOT + D_FEAT + N_CLS_PAD)
    live = tm_eff * (2 * D_FEAT                             # bf16 x tile
                     + 6 * D_BOT                            # h1 f32 + bf16
                     + 6 * D_CHUNK                          # h2 chunk f32 + bf16
                     + 4 * N_CLS_PAD)                       # logits accumulator
    total = feat + outb + wts + bias + live + (8 << 20)     # + Mosaic scratch headroom
    return min(_round_up(total, 1 << 20), 64 << 20)


def adapter_kernel(x_ref, w1_ref, b1_ref, w2_ref, b2_ref, wc_ref, bc_ref, o_ref):
    """Fused adapter MLP + classifier for one batch tile.

    x_ref : (TM, 2560)        f32 features (cast to bf16 in-VMEM)
    w1    : (2560, 128)       bf16 adapter down-proj     b1: (1, 128)        f32
    w2    : (5, 128, 512)     bf16 adapter up-proj, chunked over D_FEAT
    b2    : (5, 1, 512)       f32
    wc    : (5, 512, 128)     bf16 classifier (padded 10 -> 128), chunked
    bc    : (1, 128)          f32
    o_ref : (TM, 128)         f32 padded logits
    """
    x = x_ref[...].astype(jnp.bfloat16)          # cast happens in VMEM, not HBM

    # adapter: Linear(2560 -> 128) + ReLU   (Dropout == identity in eval)
    h1 = jnp.dot(x, w1_ref[...], preferred_element_type=jnp.float32) + b1_ref[...]
    h1 = jnp.maximum(h1, 0.0).astype(jnp.bfloat16)

    # adapter up-proj + ReLU fused with classifier, chunked over D_FEAT so the
    # (TM, 2560) f32 intermediate never materializes in VMEM.
    def body(c, acc):
        h2_c = jnp.dot(h1, w2_ref[c], preferred_element_type=jnp.float32) + b2_ref[c]
        h2_c = jnp.maximum(h2_c, 0.0).astype(jnp.bfloat16)
        return acc + jnp.dot(h2_c, wc_ref[c], preferred_element_type=jnp.float32)

    logits = lax.fori_loop(
        0, N_CHUNK, body,
        jnp.zeros((x.shape[0], N_CLS_PAD), jnp.float32),
        unroll=True,
    )
    o_ref[...] = (logits + bc_ref[...]).astype(o_ref.dtype)


def prepare_params(params):
    """One-time parameter prep (hoisted out of the per-call path):
    bf16 weights, (1, D) f32 biases, classifier padded 10 -> 128 lanes, and
    up-proj / classifier reshaped into D_FEAT chunks for the in-kernel loop."""
    w1, b1, w2, b2, wc, bc = params

    wc_p = jnp.zeros((D_FEAT, N_CLS_PAD), jnp.float32).at[:, :N_CLS].set(wc)
    bc_p = jnp.zeros((1, N_CLS_PAD), jnp.float32).at[:, :N_CLS].set(bc)

    # (128, 2560) -> (5, 128, 512): chunk the output-feature axis.
    w2_c = w2.reshape(D_BOT, N_CHUNK, D_CHUNK).transpose(1, 0, 2)
    b2_c = b2.reshape(N_CHUNK, 1, D_CHUNK)
    # (2560, 128) -> (5, 512, 128): chunk the input-feature axis.
    wc_c = wc_p.reshape(N_CHUNK, D_CHUNK, N_CLS_PAD)

    return (
        w1.astype(jnp.bfloat16),
        b1.reshape(1, D_BOT).astype(jnp.float32),
        w2_c.astype(jnp.bfloat16),
        b2_c.astype(jnp.float32),
        wc_c.astype(jnp.bfloat16),
        bc_p,
    )


def baseline_adapter_forward(features, prepared_params, *, tm=512):
    """features: (B, 2560) float. Returns (B, 10) f32 logits."""
    w1, b1, w2_c, b2_c, wc_c, bc_p = prepared_params
    B = features.shape[0]

    tm_eff = _choose_tile(B, tm)
    grid = _cdiv(B, tm_eff)       # partial last block handled by Pallas, no jnp.pad

    out_padded = pl.pallas_call(
        adapter_kernel,
        out_shape=jax.ShapeDtypeStruct((B, N_CLS_PAD), jnp.float32),
        grid_spec=pltpu.PrefetchScalarGridSpec(
            num_scalar_prefetch=0,
            grid=(grid,),
            in_specs=[
                pl.BlockSpec((tm_eff, D_FEAT), lambda i: (i, 0)),            # features tile
                pl.BlockSpec((D_FEAT, D_BOT), lambda i: (0, 0)),             # w1 (resident)
                pl.BlockSpec((1, D_BOT), lambda i: (0, 0)),                  # b1
                pl.BlockSpec((N_CHUNK, D_BOT, D_CHUNK), lambda i: (0, 0, 0)),        # w2 chunks
                pl.BlockSpec((N_CHUNK, 1, D_CHUNK), lambda i: (0, 0, 0)),            # b2 chunks
                pl.BlockSpec((N_CHUNK, D_CHUNK, N_CLS_PAD), lambda i: (0, 0, 0)),    # wc chunks
                pl.BlockSpec((1, N_CLS_PAD), lambda i: (0, 0)),              # bc (padded)
            ],
            out_specs=pl.BlockSpec((tm_eff, N_CLS_PAD), lambda i: (i, 0)),
        ),
        compiler_params=pltpu.CompilerParams(
            dimension_semantics=("parallel",),          # batch axis -> megacore/2-TC shard
            vmem_limit_bytes=_vmem_limit_bytes(tm_eff),
        ),
    )(features, w1, b1, w2_c, b2_c, wc_c, bc_p)

    return out_padded[:, :N_CLS]


def init_params(key):
    """Deterministic init mimicking nn.Linear's uniform(-1/sqrt(fan_in), +)."""
    ks = jax.random.split(key, 6)

    def lin(kw, kb, fan_in, fan_out):
        bound = 1.0 / jnp.sqrt(fan_in)
        w = jax.random.uniform(kw, (fan_in, fan_out), jnp.float32, -bound, bound)
        b = jax.random.uniform(kb, (fan_out,), jnp.float32, -bound, bound)
        return w, b

    w1, b1 = lin(ks[0], ks[1], D_FEAT, D_BOT)
    w2, b2 = lin(ks[2], ks[3], D_BOT, D_FEAT)
    wc, bc = lin(ks[4], ks[5], D_FEAT, N_CLS)
    return (w1, b1, w2, b2, wc, bc)


def reference_forward_f32(features, params):
    w1, b1, w2, b2, wc, bc = params
    h1 = jnp.maximum(features @ w1 + b1, 0.0)
    h2 = jnp.maximum(h1 @ w2 + b2, 0.0)
    return h2 @ wc + bc


def reference_forward_bf16(features, params):
    """Same bf16-input / f32-accumulate math as the kernel (tight-tolerance ref)."""
    w1, b1, w2, b2, wc, bc = params
    x = features.astype(jnp.bfloat16)
    h1 = jnp.dot(x, w1.astype(jnp.bfloat16), preferred_element_type=jnp.float32) + b1
    h1 = jnp.maximum(h1, 0.0).astype(jnp.bfloat16)
    h2 = jnp.dot(h1, w2.astype(jnp.bfloat16), preferred_element_type=jnp.float32) + b2
    h2 = jnp.maximum(h2, 0.0).astype(jnp.bfloat16)
    return jnp.dot(h2, wc.astype(jnp.bfloat16), preferred_element_type=jnp.float32) + bc


if __name__ == "__main__":
    key = jax.random.PRNGKey(0)
    k_x, k_p = jax.random.split(key)

    params = init_params(k_p)
    prepared = prepare_params(params)

    # Case 1: small aligned batch (stand-in for teacher.get_features(x) output).
    B = 8
    features = jax.random.normal(k_x, (B, D_FEAT), jnp.float32)
    logits = jax.block_until_ready(baseline_adapter_forward(features, prepared))
    assert logits.shape == (B, N_CLS)

    ref_f32 = jax.block_until_ready(reference_forward_f32(features, params))
    ref_bf16 = jax.block_until_ready(reference_forward_bf16(features, params))
    assert jnp.max(jnp.abs(logits - ref_bf16)) < 2e-3, "mismatch vs bf16-matched ref"
    assert jnp.max(jnp.abs(logits - ref_f32)) < 5e-2, "mismatch vs pure-f32 ref"

    # Case 2: ragged batch (exercises the cdiv grid + partial-block path).
    B2 = 13
    features2 = jax.random.normal(jax.random.PRNGKey(1), (B2, D_FEAT), jnp.float32)
    logits2 = jax.block_until_ready(baseline_adapter_forward(features2, prepared))
    assert logits2.shape == (B2, N_CLS)
    ref2 = jax.block_until_ready(reference_forward_bf16(features2, params))
    assert jnp.max(jnp.abs(logits2 - ref2)) < 2e-3, "mismatch on ragged batch"

    # Case 3: multi-step grid with a partial last tile (>= 2 grid steps).
    B3 = 40
    features3 = jax.random.normal(jax.random.PRNGKey(2), (B3, D_FEAT), jnp.float32)
    logits3 = jax.block_until_ready(baseline_adapter_forward(features3, prepared))
    assert logits3.shape == (B3, N_CLS)
    ref3 = jax.block_until_ready(reference_forward_bf16(features3, params))
    assert jnp.max(jnp.abs(logits3 - ref3)) < 2e-3, "mismatch on multi-tile batch"

    print("KERNEL_OK")
</pallas_src>

<mosaic_0001>
module attributes {stable_mosaic.version = 11 : i64} {
  func.func @adapter_kernel(%arg0: i32, %arg1: memref<8x2560xf32, #tpu.memory_space<vmem>>, %arg2: memref<2560x128xbf16, #tpu.memory_space<vmem>>, %arg3: memref<1x128xf32, #tpu.memory_space<vmem>>, %arg4: memref<5x128x512xbf16, #tpu.memory_space<vmem>>, %arg5: memref<5x1x512xf32, #tpu.memory_space<vmem>>, %arg6: memref<5x512x128xbf16, #tpu.memory_space<vmem>>, %arg7: memref<1x128xf32, #tpu.memory_space<vmem>>, %arg8: memref<8x128xf32, #tpu.memory_space<vmem>>) attributes {dimension_semantics = [#tpu.dimension_semantics<parallel>], iteration_bounds = array<i64: 1>, scalar_prefetch = 0 : i64, scratch_operands = 0 : i64, tpu.core_type = #tpu.core_type<tc>, window_params = [{transform_indices = @transform_0, window_bounds = array<i64: 8, 2560>}, {pipeline_mode = #tpu.pipeline_mode<synchronous>, transform_indices = @transform_1, window_bounds = array<i64: 2560, 128>}, {pipeline_mode = #tpu.pipeline_mode<synchronous>, transform_indices = @transform_2, window_bounds = array<i64: 1, 128>}, {pipeline_mode = #tpu.pipeline_mode<synchronous>, transform_indices = @transform_3, window_bounds = array<i64: 5, 128, 512>}, {pipeline_mode = #tpu.pipeline_mode<synchronous>, transform_indices = @transform_4, window_bounds = array<i64: 5, 1, 512>}, {pipeline_mode = #tpu.pipeline_mode<synchronous>, transform_indices = @transform_5, window_bounds = array<i64: 5, 512, 128>}, {pipeline_mode = #tpu.pipeline_mode<synchronous>, transform_indices = @transform_6, window_bounds = array<i64: 1, 128>}, {transform_indices = @transform_7, window_bounds = array<i64: 8, 128>}]} {
    %c0 = arith.constant 0 : index
    %c0_0 = arith.constant 0 : index
    %0 = vector.load %arg1[%c0, %c0_0] : memref<8x2560xf32, #tpu.memory_space<vmem>>, vector<8x2560xf32>
    %1 = arith.truncf %0 : vector<8x2560xf32> to vector<8x2560xbf16>
    %c0_1 = arith.constant 0 : index
    %c0_2 = arith.constant 0 : index
    %2 = vector.load %arg2[%c0_1, %c0_2] : memref<2560x128xbf16, #tpu.memory_space<vmem>>, vector<2560x128xbf16>
    %cst = arith.constant dense<0.000000e+00> : vector<8x128xf32>
    %3 = tpu.matmul %1, %2, %cst {dimension_numbers = #tpu.dot_dimension_numbers<[1], [0], [0], [1], [0, 0, 1, 1], [], []>} : vector<8x2560xbf16>, vector<2560x128xbf16>, vector<8x128xf32> -> vector<8x128xf32>
    %c0_3 = arith.constant 0 : index
    %c0_4 = arith.constant 0 : index
    %4 = vector.load %arg3[%c0_3, %c0_4] : memref<1x128xf32, #tpu.memory_space<vmem>>, vector<1x128xf32>
    %5 = vector.broadcast %4 : vector<1x128xf32> to vector<8x128xf32>
    %6 = arith.addf %3, %5 : vector<8x128xf32>
    %cst_5 = arith.constant 0.000000e+00 : f32
    %7 = vector.broadcast %cst_5 : f32 to vector<8x128xf32>
    %8 = arith.maximumf %6, %7 : vector<8x128xf32>
    %9 = arith.truncf %8 : vector<8x128xf32> to vector<8x128xbf16>
    %cst_6 = arith.constant 0.000000e+00 : f32
    %10 = vector.broadcast %cst_6 : f32 to vector<8x128xf32>
    %c0_i32 = arith.constant 0 : i32
    %11 = arith.index_cast %c0_i32 : i32 to index
    %c0_7 = arith.constant 0 : index
    %c0_8 = arith.constant 0 : index
    %12 = vector.load %arg4[%11, %c0_7, %c0_8] : memref<5x128x512xbf16, #tpu.memory_space<vmem>>, vector<1x128x512xbf16>
    %13 = vector.shape_cast %12 : vector<1x128x512xbf16> to vector<128x512xbf16>
    %cst_9 = arith.constant dense<0.000000e+00> : vector<8x512xf32>
    %14 = tpu.matmul %9, %13, %cst_9 {dimension_numbers = #tpu.dot_dimension_numbers<[1], [0], [0], [1], [0, 0, 1, 1], [], []>} : vector<8x128xbf16>, vector<128x512xbf16>, vector<8x512xf32> -> vector<8x512xf32>
    %15 = arith.index_cast %c0_i32 : i32 to index
    %c0_10 = arith.constant 0 : index
    %c0_11 = arith.constant 0 : index
    %16 = vector.load %arg5[%15, %c0_10, %c0_11] : memref<5x1x512xf32, #tpu.memory_space<vmem>>, vector<1x1x512xf32>
    %17 = vector.shape_cast %16 : vector<1x1x512xf32> to vector<1x512xf32>
    %18 = vector.broadcast %17 : vector<1x512xf32> to vector<8x512xf32>
    %19 = arith.addf %14, %18 : vector<8x512xf32>
    %cst_12 = arith.constant 0.000000e+00 : f32
    %20 = vector.broadcast %cst_12 : f32 to vector<8x512xf32>
    %21 = arith.maximumf %19, %20 : vector<8x512xf32>
    %22 = arith.truncf %21 : vector<8x512xf32> to vector<8x512xbf16>
    %23 = arith.index_cast %c0_i32 : i32 to index
    %c0_13 = arith.constant 0 : index
    %c0_14 = arith.constant 0 : index
    %24 = vector.load %arg6[%23, %c0_13, %c0_14] : memref<5x512x128xbf16, #tpu.memory_space<vmem>>, vector<1x512x128xbf16>
    %25 = vector.shape_cast %24 : vector<1x512x128xbf16> to vector<512x128xbf16>
    %cst_15 = arith.constant dense<0.000000e+00> : vector<8x128xf32>
    %26 = tpu.matmul %22, %25, %cst_15 {dimension_numbers = #tpu.dot_dimension_numbers<[1], [0], [0], [1], [0, 0, 1, 1], [], []>} : vector<8x512xbf16>, vector<512x128xbf16>, vector<8x128xf32> -> vector<8x128xf32>
    %27 = arith.addf %10, %26 : vector<8x128xf32>
    %c1_i32 = arith.constant 1 : i32
    %28 = arith.index_cast %c1_i32 : i32 to index
    %c0_16 = arith.constant 0 : index
    %c0_17 = arith.constant 0 : index
    %29 = vector.load %arg4[%28, %c0_16, %c0_17] : memref<5x128x512xbf16, #tpu.memory_space<vmem>>, vector<1x128x512xbf16>
    %30 = vector.shape_cast %29 : vector<1x128x512xbf16> to vector<128x512xbf16>
    %cst_18 = arith.constant dense<0.000000e+00> : vector<8x512xf32>
    %31 = tpu.matmul %9, %30, %cst_18 {dimension_numbers = #tpu.dot_dimension_numbers<[1], [0], [0], [1], [0, 0, 1, 1], [], []>} : vector<8x128xbf16>, vector<128x512xbf16>, vector<8x512xf32> -> vector<8x512xf32>
    %32 = arith.index_cast %c1_i32 : i32 to index
    %c0_19 = arith.constant 0 : index
    %c0_20 = arith.constant 0 : index
    %33 = vector.load %arg5[%32, %c0_19, %c0_20] : memref<5x1x512xf32, #tpu.memory_space<vmem>>, vector<1x1x512xf32>
    %34 = vector.shape_cast %33 : vector<1x1x512xf32> to vector<1x512xf32>
    %35 = vector.broadcast %34 : vector<1x512xf32> to vector<8x512xf32>
    %36 = arith.addf %31, %35 : vector<8x512xf32>
    %cst_21 = arith.constant 0.000000e+00 : f32
    %37 = vector.broadcast %cst_21 : f32 to vector<8x512xf32>
    %38 = arith.maximumf %36, %37 : vector<8x512xf32>
    %39 = arith.truncf %38 : vector<8x512xf32> to vector<8x512xbf16>
    %40 = arith.index_cast %c1_i32 : i32 to index
    %c0_22 = arith.constant 0 : index
    %c0_23 = arith.constant 0 : index
    %41 = vector.load %arg6[%40, %c0_22, %c0_23] : memref<5x512x128xbf16, #tpu.memory_space<vmem>>, vector<1x512x128xbf16>
    %42 = vector.shape_cast %41 : vector<1x512x128xbf16> to vector<512x128xbf16>
    %cst_24 = arith.constant dense<0.000000e+00> : vector<8x128xf32>
    %43 = tpu.matmul %39, %42, %cst_24 {dimension_numbers = #tpu.dot_dimension_numbers<[1], [0], [0], [1], [0, 0, 1, 1], [], []>} : vector<8x512xbf16>, vector<512x128xbf16>, vector<8x128xf32> -> vector<8x128xf32>
    %44 = arith.addf %27, %43 : vector<8x128xf32>
    %c2_i32 = arith.constant 2 : i32
    %45 = arith.index_cast %c2_i32 : i32 to index
    %c0_25 = arith.constant 0 : index
    %c0_26 = arith.constant 0 : index
    %46 = vector.load %arg4[%45, %c0_25, %c0_26] : memref<5x128x512xbf16, #tpu.memory_space<vmem>>, vector<1x128x512xbf16>
    %47 = vector.shape_cast %46 : vector<1x128x512xbf16> to vector<128x512xbf16>
    %cst_27 = arith.constant dense<0.000000e+00> : vector<8x512xf32>
    %48 = tpu.matmul %9, %47, %cst_27 {dimension_numbers = #tpu.dot_dimension_numbers<[1], [0], [0], [1], [0, 0, 1, 1], [], []>} : vector<8x128xbf16>, vector<128x512xbf16>, vector<8x512xf32> -> vector<8x512xf32>
    %49 = arith.index_cast %c2_i32 : i32 to index
    %c0_28 = arith.constant 0 : index
    %c0_29 = arith.constant 0 : index
    %50 = vector.load %arg5[%49, %c0_28, %c0_29] : memref<5x1x512xf32, #tpu.memory_space<vmem>>, vector<1x1x512xf32>
    %51 = vector.shape_cast %50 : vector<1x1x512xf32> to vector<1x512xf32>
    %52 = vector.broadcast %51 : vector<1x512xf32> to vector<8x512xf32>
    %53 = arith.addf %48, %52 : vector<8x512xf32>
    %cst_30 = arith.constant 0.000000e+00 : f32
    %54 = vector.broadcast %cst_30 : f32 to vector<8x512xf32>
    %55 = arith.maximumf %53, %54 : vector<8x512xf32>
    %56 = arith.truncf %55 : vector<8x512xf32> to vector<8x512xbf16>
    %57 = arith.index_cast %c2_i32 : i32 to index
    %c0_31 = arith.constant 0 : index
    %c0_32 = arith.constant 0 : index
    %58 = vector.load %arg6[%57, %c0_31, %c0_32] : memref<5x512x128xbf16, #tpu.memory_space<vmem>>, vector<1x512x128xbf16>
    %59 = vector.shape_cast %58 : vector<1x512x128xbf16> to vector<512x128xbf16>
    %cst_33 = arith.constant dense<0.000000e+00> : vector<8x128xf32>
    %60 = tpu.matmul %56, %59, %cst_33 {dimension_numbers = #tpu.dot_dimension_numbers<[1], [0], [0], [1], [0, 0, 1, 1], [], []>} : vector<8x512xbf16>, vector<512x128xbf16>, vector<8x128xf32> -> vector<8x128xf32>
    %61 = arith.addf %44, %60 : vector<8x128xf32>
    %c3_i32 = arith.constant 3 : i32
    %62 = arith.index_cast %c3_i32 : i32 to index
    %c0_34 = arith.constant 0 : index
    %c0_35 = arith.constant 0 : index
    %63 = vector.load %arg4[%62, %c0_34, %c0_35] : memref<5x128x512xbf16, #tpu.memory_space<vmem>>, vector<1x128x512xbf16>
    %64 = vector.shape_cast %63 : vector<1x128x512xbf16> to vector<128x512xbf16>
    %cst_36 = arith.constant dense<0.000000e+00> : vector<8x512xf32>
    %65 = tpu.matmul %9, %64, %cst_36 {dimension_numbers = #tpu.dot_dimension_numbers<[1], [0], [0], [1], [0, 0, 1, 1], [], []>} : vector<8x128xbf16>, vector<128x512xbf16>, vector<8x512xf32> -> vector<8x512xf32>
    %66 = arith.index_cast %c3_i32 : i32 to index
    %c0_37 = arith.constant 0 : index
    %c0_38 = arith.constant 0 : index
    %67 = vector.load %arg5[%66, %c0_37, %c0_38] : memref<5x1x512xf32, #tpu.memory_space<vmem>>, vector<1x1x512xf32>
    %68 = vector.shape_cast %67 : vector<1x1x512xf32> to vector<1x512xf32>
    %69 = vector.broadcast %68 : vector<1x512xf32> to vector<8x512xf32>
    %70 = arith.addf %65, %69 : vector<8x512xf32>
    %cst_39 = arith.constant 0.000000e+00 : f32
    %71 = vector.broadcast %cst_39 : f32 to vector<8x512xf32>
    %72 = arith.maximumf %70, %71 : vector<8x512xf32>
    %73 = arith.truncf %72 : vector<8x512xf32> to vector<8x512xbf16>
    %74 = arith.index_cast %c3_i32 : i32 to index
    %c0_40 = arith.constant 0 : index
    %c0_41 = arith.constant 0 : index
    %75 = vector.load %arg6[%74, %c0_40, %c0_41] : memref<5x512x128xbf16, #tpu.memory_space<vmem>>, vector<1x512x128xbf16>
    %76 = vector.shape_cast %75 : vector<1x512x128xbf16> to vector<512x128xbf16>
    %cst_42 = arith.constant dense<0.000000e+00> : vector<8x128xf32>
    %77 = tpu.matmul %73, %76, %cst_42 {dimension_numbers = #tpu.dot_dimension_numbers<[1], [0], [0], [1], [0, 0, 1, 1], [], []>} : vector<8x512xbf16>, vector<512x128xbf16>, vector<8x128xf32> -> vector<8x128xf32>
    %78 = arith.addf %61, %77 : vector<8x128xf32>
    %c4_i32 = arith.constant 4 : i32
    %79 = arith.index_cast %c4_i32 : i32 to index
    %c0_43 = arith.constant 0 : index
    %c0_44 = arith.constant 0 : index
    %80 = vector.load %arg4[%79, %c0_43, %c0_44] : memref<5x128x512xbf16, #tpu.memory_space<vmem>>, vector<1x128x512xbf16>
    %81 = vector.shape_cast %80 : vector<1x128x512xbf16> to vector<128x512xbf16>
    %cst_45 = arith.constant dense<0.000000e+00> : vector<8x512xf32>
    %82 = tpu.matmul %9, %81, %cst_45 {dimension_numbers = #tpu.dot_dimension_numbers<[1], [0], [0], [1], [0, 0, 1, 1], [], []>} : vector<8x128xbf16>, vector<128x512xbf16>, vector<8x512xf32> -> vector<8x512xf32>
    %83 = arith.index_cast %c4_i32 : i32 to index
    %c0_46 = arith.constant 0 : index
    %c0_47 = arith.constant 0 : index
    %84 = vector.load %arg5[%83, %c0_46, %c0_47] : memref<5x1x512xf32, #tpu.memory_space<vmem>>, vector<1x1x512xf32>
    %85 = vector.shape_cast %84 : vector<1x1x512xf32> to vector<1x512xf32>
    %86 = vector.broadcast %85 : vector<1x512xf32> to vector<8x512xf32>
    %87 = arith.addf %82, %86 : vector<8x512xf32>
    %cst_48 = arith.constant 0.000000e+00 : f32
    %88 = vector.broadcast %cst_48 : f32 to vector<8x512xf32>
    %89 = arith.maximumf %87, %88 : vector<8x512xf32>
    %90 = arith.truncf %89 : vector<8x512xf32> to vector<8x512xbf16>
    %91 = arith.index_cast %c4_i32 : i32 to index
    %c0_49 = arith.constant 0 : index
    %c0_50 = arith.constant 0 : index
    %92 = vector.load %arg6[%91, %c0_49, %c0_50] : memref<5x512x128xbf16, #tpu.memory_space<vmem>>, vector<1x512x128xbf16>
    %93 = vector.shape_cast %92 : vector<1x512x128xbf16> to vector<512x128xbf16>
    %cst_51 = arith.constant dense<0.000000e+00> : vector<8x128xf32>
    %94 = tpu.matmul %90, %93, %cst_51 {dimension_numbers = #tpu.dot_dimension_numbers<[1], [0], [0], [1], [0, 0, 1, 1], [], []>} : vector<8x512xbf16>, vector<512x128xbf16>, vector<8x128xf32> -> vector<8x128xf32>
    %95 = arith.addf %78, %94 : vector<8x128xf32>
    %c5_i32 = arith.constant 5 : i32
    %c0_52 = arith.constant 0 : index
    %c0_53 = arith.constant 0 : index
    %96 = vector.load %arg7[%c0_52, %c0_53] : memref<1x128xf32, #tpu.memory_space<vmem>>, vector<1x128xf32>
    %97 = vector.broadcast %96 : vector<1x128xf32> to vector<8x128xf32>
    %98 = arith.addf %95, %97 : vector<8x128xf32>
    %c0_54 = arith.constant 0 : index
    %c0_55 = arith.constant 0 : index
    %99 = vector.load %arg8[%c0_54, %c0_55] : memref<8x128xf32, #tpu.memory_space<vmem>>, vector<8x128xf32>
    tpu.vector_store %arg8[%c0_54, %c0_55], %98 {strides = array<i32>} : memref<8x128xf32, #tpu.memory_space<vmem>>, vector<8x128xf32>,
    return
  }
  func.func @transform_0(%arg0: i32) -> (i32, i32) {
    %c0_i32 = arith.constant 0 : i32
    %c0_i32_0 = arith.constant 0 : i32
    return %arg0, %c0_i32 : i32, i32
  }
  func.func @transform_1(%arg0: i32) -> (i32, i32) {
    %c0_i32 = arith.constant 0 : i32
    %c0_i32_0 = arith.constant 0 : i32
    %c0_i32_1 = arith.constant 0 : i32
    return %c0_i32, %c0_i32_0 : i32, i32
  }
  func.func @transform_2(%arg0: i32) -> (i32, i32) {
    %c0_i32 = arith.constant 0 : i32
    %c0_i32_0 = arith.constant 0 : i32
    %c0_i32_1 = arith.constant 0 : i32
    return %c0_i32, %c0_i32_0 : i32, i32
  }
  func.func @transform_3(%arg0: i32) -> (i32, i32, i32) {
    %c0_i32 = arith.constant 0 : i32
    %c0_i32_0 = arith.constant 0 : i32
    %c0_i32_1 = arith.constant 0 : i32
    %c0_i32_2 = arith.constant 0 : i32
    return %c0_i32, %c0_i32_0, %c0_i32_1 : i32, i32, i32
  }
  func.func @transform_4(%arg0: i32) -> (i32, i32, i32) {
    %c0_i32 = arith.constant 0 : i32
    %c0_i32_0 = arith.constant 0 : i32
    %c0_i32_1 = arith.constant 0 : i32
    %c0_i32_2 = arith.constant 0 : i32
    return %c0_i32, %c0_i32_0, %c0_i32_1 : i32, i32, i32
  }
  func.func @transform_5(%arg0: i32) -> (i32, i32, i32) {
    %c0_i32 = arith.constant 0 : i32
    %c0_i32_0 = arith.constant 0 : i32
    %c0_i32_1 = arith.constant 0 : i32
    %c0_i32_2 = arith.constant 0 : i32
    return %c0_i32, %c0_i32_0, %c0_i32_1 : i32, i32, i32
  }
  func.func @transform_6(%arg0: i32) -> (i32, i32) {
    %c0_i32 = arith.constant 0 : i32
    %c0_i32_0 = arith.constant 0 : i32
    %c0_i32_1 = arith.constant 0 : i32
    return %c0_i32, %c0_i32_0 : i32, i32
  }
  func.func @transform_7(%arg0: i32) -> (i32, i32) {
    %c0_i32 = arith.constant 0 : i32
    %c0_i32_0 = arith.constant 0 : i32
    return %arg0, %c0_i32 : i32, i32
  }
}

</mosaic_0001>

<bundles_post_ra>
// kernel: tpu_custom_call.1
= control target key start
LH: loop header
LB: loop body
LE: loop exit
PB: predicated region body
PF: predicated region fallthrough
CT: control target
= control target key end

     0   :  { %12 = vsyncpa [#allocation3], 0  ;;  %s7305_s0 = inlined_call_operand.hbm [shape: f32[8,2560], index: 0, kind: input, shape index: {}]   ;;  %s7306_s1 = inlined_call_operand.hbm [shape: bf16[2560,128], index: 1, kind: input, shape index: {}]   ;;  %s7307_s2 = inlined_call_operand.vmem [shape: f32[1,128], index: 2, kind: input, shape index: {}]   ;;  %s7308_s3 = inlined_call_operand.hbm [shape: bf16[5,128,512], index: 3, kind: input, shape index: {}]   ;;  %s7309_s4 = inlined_call_operand.hbm [shape: f32[5,1,512], index: 4, kind: input, shape index: {}]   ;;  %s7310_s5 = inlined_call_operand.hbm [shape: bf16[5,512,128], index: 5, kind: input, shape index: {}]   ;;  %s7311_s6 = inlined_call_operand.vmem [shape: f32[1,128], index: 6, kind: input, shape index: {}]   ;;  %s7312_s7 = inlined_call_operand.hbm [shape: f32[8,128], index: 7, kind: output, shape index: {}]  }
   0x1   :  { %13 = vsyncpa [#allocation6], 0 }
   0x2   :  { %14 = vsyncpa [#allocation9], 0  ;;  %s31_s26 = sshll.u32 %s7306_s1, 4  ;;  %s32_s26 = int_to_ptr.hbm [resolvable:$true] %s31_s26 }
   0x3   :  { %15 = vsyncpa [#allocation4], 0  ;;  %s7143_s27 = smov [#allocation5]   ;;  %s59_s8 = sshll.u32 %s7309_s4, 4  ;;  %s60_s8 = int_to_ptr.hbm [resolvable:$true] %s59_s8 }
   0x4   :  { %s33_s28 = sshll.u32 %s7143_s27, 4  ;;  %s7144_s9 = smov 64   ;;  %s34_s28 = int_to_ptr.vmem [resolvable:$true] %s33_s28 }
   0x5   :  { %s7145_s10 = smov 4   ;;  %s7146_s11 = smov [#allocation8]  }
   0x6   :  { %39 = dma.hbm_to_vmem [thread:$0]  %s32_s26, 20480, %s34_s28, [#allocation6], %s7144_s9, %s7144_s9, %s7145_s10  }
   0x7   :  { %s61_s12 = sshll.u32 %s7146_s11, 4  ;;  %s21_s14 = sshll.u32 %s7305_s0, 4  ;;  %s62_s12 = int_to_ptr.vmem [resolvable:$true] %s61_s12  ;;  %s22_s14 = int_to_ptr.hbm [resolvable:$true] %s21_s14 }
   0x8   :  { %67 = dma.hbm_to_vmem [thread:$0]  %s60_s8, 320, %s62_s12, [#allocation9], %s7144_s9, %s7144_s9, %s7145_s10  }
   0x9   :  { %s46_s16 = sshll.u32 %s7308_s3, 4  ;;  %s7147_s17 = smov [#allocation2]   ;;  %s47_s16 = int_to_ptr.hbm [resolvable:$true] %s46_s16 }
   0xa   :  { %s23_s18 = sshll.u32 %s7147_s17, 4  ;;  %s7148_s19 = smov [#allocation7]   ;;  %s24_s18 = int_to_ptr.vmem [resolvable:$true] %s23_s18 }
   0xb   :  { %26 = dma.hbm_to_vmem [thread:$0]  %s22_s14, 2560, %s24_s18, [#allocation3]  }
   0xc   :  { %s48_s20 = sshll.u32 %s7148_s19, 4  ;;  %s7149_s21 = smov 256   ;;  %s49_s20 = int_to_ptr.vmem [resolvable:$true] %s48_s20 }
   0xd   :  { %s7150_s0 = smov 16   ;;  %s72_s24 = sshll.u32 %s7310_s5, 4  ;;  %s73_s24 = int_to_ptr.hbm [resolvable:$true] %s72_s24 }
   0xe   :  { %54 = dma.hbm_to_vmem [thread:$0]  %s47_s16, 20480, %s49_s20, [#allocation6], %s7149_s21, %s7149_s21, %s7150_s0  }
   0xf   :  { %s7151_s25 = smov [#allocation10]  }
  0x10   :  { %s74_s26 = sshll.u32 %s7151_s25, 4  ;;  %s75_s26 = int_to_ptr.vmem [resolvable:$true] %s74_s26 }
  0x11   :  { %80 = dma.hbm_to_vmem [thread:$0]  %s73_s24, 20480, %s75_s26, [#allocation9], %s7144_s9, %s7144_s9, %s7145_s10  }
  0x12   :  { %7135 = dma.done.wait [#allocation3], 2560  }
  0x13   :  { %7136 = vsyncadd [#allocation3], 4294964736 }
  0x14   :  { %7137 = dma.done.wait [#allocation6], 40960  }
  0x15   :  { %7138 = vsyncadd [#allocation6], 4294926336 }
  0x16   :  { %7139 = dma.done.wait [#allocation9], 20800  }
  0x17   :  { %7140 = vsyncadd [#allocation9], 4294946496  ;;  %v6506_v0 = vld [vmem:[#allocation5 + $0x38] sm:$0xff]  ;;  %v6505_v4 = vld [vmem:[#allocation5 + $0x30] sm:$0xff]  ;;  %s7152_s28 = smov [#allocation11]   ;;  %s4567_s9 = sshll.u32 %s7312_s7, 4  ;;  %s4568_s9 = int_to_ptr.hbm [resolvable:$true] %s4567_s9 }
  0x18   :  { %v6514_v1 = vld [vmem:[#allocation5 + $0x78] sm:$0xff]  ;;  %1427 = vmatpush.bf16.msra.mxu0 %v6506_v0  ;;  %v6513_v5 = vld [vmem:[#allocation5 + $0x70] sm:$0xff]  ;;  %v6504_v8 = vld [vmem:[#allocation5 + $0x28] sm:$0xff]  ;;  %s4565_s29 = sshll.u32 %s7152_s28, 4  ;;  %s4566_s29 = int_to_ptr.vmem [resolvable:$true] %s4565_s29 }
  0x19   :  { %v6522_v2 = vld [vmem:[#allocation5 + $0xb8] sm:$0xff]  ;;  %1440 = vmatpush.bf16.msra.mxu1 %v6514_v1  ;;  %v6521_v6 = vld [vmem:[#allocation5 + $0xb0] sm:$0xff]  ;;  %v6512_v9 = vld [vmem:[#allocation5 + $0x68] sm:$0xff] }
  0x1a   :  { %v6530_v3 = vld [vmem:[#allocation5 + $0xf8] sm:$0xff]  ;;  %1453 = vmatpush.bf16.msra.mxu2 %v6522_v2  ;;  %v6529_v7 = vld [vmem:[#allocation5 + $0xf0] sm:$0xff]  ;;  %v6520_v10 = vld [vmem:[#allocation5 + $0xa8] sm:$0xff] }
  0x1b   :  { %1466 = vmatpush.bf16.msra.mxu3 %v6530_v3  ;;  %v6528_v11 = vld [vmem:[#allocation5 + $0xe8] sm:$0xff]  ;;  %v6503_v12 = vld [vmem:[#allocation5 + $0x20] sm:$0xff]  ;;  %v6502_v16 = vld [vmem:[#allocation5 + $0x18] sm:$0xff] }
  0x1c   :  { %1428 = vmatpush.bf16.msra.mxu0 %v6505_v4  ;;  %v6511_v13 = vld [vmem:[#allocation5 + $0x60] sm:$0xff]  ;;  %v6510_v17 = vld [vmem:[#allocation5 + $0x58] sm:$0xff]  ;;  %v6501_v20 = vld [vmem:[#allocation5 + $0x10] sm:$0xff] }
  0x1d   :  { %1441 = vmatpush.bf16.msra.mxu1 %v6513_v5  ;;  %v6519_v14 = vld [vmem:[#allocation5 + $0xa0] sm:$0xff]  ;;  %v6518_v18 = vld [vmem:[#allocation5 + $0x98] sm:$0xff]  ;;  %v6509_v21 = vld [vmem:[#allocation5 + $0x50] sm:$0xff] }
  0x1e   :  { %1454 = vmatpush.bf16.msra.mxu2 %v6521_v6  ;;  %v6527_v15 = vld [vmem:[#allocation5 + $0xe0] sm:$0xff]  ;;  %v6526_v19 = vld [vmem:[#allocation5 + $0xd8] sm:$0xff]  ;;  %v6517_v22 = vld [vmem:[#allocation5 + $0x90] sm:$0xff] }
  0x1f   :  { %1467 = vmatpush.bf16.msra.mxu3 %v6529_v7  ;;  %v6525_v23 = vld [vmem:[#allocation5 + $0xd0] sm:$0xff]  ;;  %v6500_v24 = vld [vmem:[#allocation5 + $0x8] sm:$0xff]  ;;  %v6499_v28 = vld [vmem:[#allocation5] sm:$0xff] }
  0x20   :  { %1429 = vmatpush.bf16.msra.mxu0 %v6504_v8  ;;  %v6508_v25 = vld [vmem:[#allocation5 + $0x48] sm:$0xff]  ;;  %v6507_v29 = vld [vmem:[#allocation5 + $0x40] sm:$0xff]  ;;  %v6538_v32 = vld [vmem:[#allocation5 + $0x138] sm:$0xff] }
  0x21   :  { %1442 = vmatpush.bf16.msra.mxu1 %v6512_v9  ;;  %v6516_v26 = vld [vmem:[#allocation5 + $0x88] sm:$0xff]  ;;  %v6515_v30 = vld [vmem:[#allocation5 + $0x80] sm:$0xff]  ;;  %v105_v33 = vld [vmem:[#allocation2 + $0x10] sm:$0xff] }
  0x22   :  { %1455 = vmatpush.bf16.msra.mxu2 %v6520_v10  ;;  %v6524_v27 = vld [vmem:[#allocation5 + $0xc8] sm:$0xff]  ;;  %v6523_v31 = vld [vmem:[#allocation5 + $0xc0] sm:$0xff]  ;;  %v6546_v35 = vld [vmem:[#allocation5 + $0x178] sm:$0xff]  ;;  %v125_v40 = vpack.c.bf16 %v105_v33, %v105_v33 }
  0x23   :  { %1468 = vmatpush.bf16.msra.mxu3 %v6528_v11  ;;  %v103_v34 = vld [vmem:[#allocation2] sm:$0xff]  ;;  %v106_v36 = vld [vmem:[#allocation2 + $0x18] sm:$0xff]  ;;  %v104_v37 = vld [vmem:[#allocation2 + $0x8] sm:$0xff] }
  0x24   :  { %1430 = vmatpush.bf16.msra.mxu0 %v6503_v12  ;;  %v6554_v38 = vld [vmem:[#allocation5 + $0x1b8] sm:$0xff]  ;;  %v123_v41 = vpack.c.bf16 %v103_v34, %v103_v34  ;;  %v126_v42 = vpack.c.bf16 %v106_v36, %v106_v36  ;;  %v124_v43 = vpack.c.bf16 %v104_v37, %v104_v37  ;;  %v6537_v44 = vld [vmem:[#allocation5 + $0x130] sm:$0xff]  ;;  %v6536_v48 = vld [vmem:[#allocation5 + $0x128] sm:$0xff] }
  0x25   :  { %1443 = vmatpush.bf16.msra.mxu1 %v6511_v13  ;;  %v6562_v39 = vld [vmem:[#allocation5 + $0x1f8] sm:$0xff]  ;;  %v6545_v45 = vld [vmem:[#allocation5 + $0x170] sm:$0xff]  ;;  %v6544_v49 = vld [vmem:[#allocation5 + $0x168] sm:$0xff] }
  0x26   :  { %1456 = vmatpush.bf16.msra.mxu2 %v6519_v14  ;;  %v6553_v46 = vld [vmem:[#allocation5 + $0x1b0] sm:$0xff]  ;;  %v6552_v50 = vld [vmem:[#allocation5 + $0x1a8] sm:$0xff]  ;;  %v6535_v52 = vld [vmem:[#allocation5 + $0x120] sm:$0xff] }
  0x27   :  { %1469 = vmatpush.bf16.msra.mxu3 %v6527_v15  ;;  %v6561_v47 = vld [vmem:[#allocation5 + $0x1f0] sm:$0xff]  ;;  %v6560_v51 = vld [vmem:[#allocation5 + $0x1e8] sm:$0xff]  ;;  %v6543_v53 = vld [vmem:[#allocation5 + $0x160] sm:$0xff] }
  0x28   :  { %1431 = vmatpush.bf16.msra.mxu0 %v6502_v16  ;;  %v6551_v54 = vld [vmem:[#allocation5 + $0x1a0] sm:$0xff]  ;;  %v6534_v56 = vld [vmem:[#allocation5 + $0x118] sm:$0xff]  ;;  %v6533_v60 = vld [vmem:[#allocation5 + $0x110] sm:$0xff] }
  0x29   :  { %1444 = vmatpush.bf16.msra.mxu1 %v6510_v17  ;;  %v6559_v55 = vld [vmem:[#allocation5 + $0x1e0] sm:$0xff]  ;;  %v6542_v57 = vld [vmem:[#allocation5 + $0x158] sm:$0xff]  ;;  %v6541_v61 = vld [vmem:[#allocation5 + $0x150] sm:$0xff] }
  0x2a   :  { %1457 = vmatpush.bf16.msra.mxu2 %v6518_v18  ;;  %v6550_v58 = vld [vmem:[#allocation5 + $0x198] sm:$0xff]  ;;  %v6549_v62 = vld [vmem:[#allocation5 + $0x190] sm:$0xff]  ;;  %v6532_v0 = vld [vmem:[#allocation5 + $0x108] sm:$0xff] }
  0x2b   :  { %1470 = vmatpush.bf16.msra.mxu3 %v6526_v19  ;;  %v6558_v59 = vld [vmem:[#allocation5 + $0x1d8] sm:$0xff]  ;;  %v6557_v63 = vld [vmem:[#allocation5 + $0x1d0] sm:$0xff]  ;;  %v6540_v1 = vld [vmem:[#allocation5 + $0x148] sm:$0xff] }
  0x2c   :  { %1432 = vmatpush.bf16.msra.mxu0 %v6501_v20  ;;  %v6548_v2 = vld [vmem:[#allocation5 + $0x188] sm:$0xff]  ;;  %v6531_v4 = vld [vmem:[#allocation5 + $0x100] sm:$0xff]  ;;  %v6570_v8 = vld [vmem:[#allocation5 + $0x238] sm:$0xff] }
  0x2d   :  { %1445 = vmatpush.bf16.msra.mxu1 %v6509_v21  ;;  %v6556_v3 = vld [vmem:[#allocation5 + $0x1c8] sm:$0xff]  ;;  %v6539_v5 = vld [vmem:[#allocation5 + $0x140] sm:$0xff]  ;;  %v109_v9 = vld [vmem:[#allocation2 + $0x30] sm:$0xff] }
  0x2e   :  { %1458 = vmatpush.bf16.msra.mxu2 %v6517_v22  ;;  %v6547_v6 = vld [vmem:[#allocation5 + $0x180] sm:$0xff]  ;;  %v6578_v11 = vld [vmem:[#allocation5 + $0x278] sm:$0xff]  ;;  %v108_v13 = vld [vmem:[#allocation2 + $0x28] sm:$0xff]  ;;  %v129_v16 = vpack.c.bf16 %v109_v9, %v109_v9 }
  0x2f   :  { %1471 = vmatpush.bf16.msra.mxu3 %v6525_v23  ;;  %v6555_v7 = vld [vmem:[#allocation5 + $0x1c0] sm:$0xff]  ;;  %v110_v12 = vld [vmem:[#allocation2 + $0x38] sm:$0xff]  ;;  %v128_v19 = vpack.c.bf16 %v108_v13, %v108_v13  ;;  %v6569_v20 = vld [vmem:[#allocation5 + $0x230] sm:$0xff] }
  0x30   :  { %1433 = vmatpush.bf16.msra.mxu0 %v6500_v24  ;;  %v107_v10 = vld [vmem:[#allocation2 + $0x20] sm:$0xff]  ;;  %v6586_v14 = vld [vmem:[#allocation5 + $0x2b8] sm:$0xff]  ;;  %v130_v18 = vpack.c.bf16 %v110_v12, %v110_v12  ;;  %v6577_v21 = vld [vmem:[#allocation5 + $0x270] sm:$0xff] }
  0x31   :  { %1446 = vmatpush.bf16.msra.mxu1 %v6508_v25  ;;  %v6594_v15 = vld [vmem:[#allocation5 + $0x2f8] sm:$0xff]  ;;  %v127_v17 = vpack.c.bf16 %v107_v10, %v107_v10  ;;  %v6585_v22 = vld [vmem:[#allocation5 + $0x2b0] sm:$0xff]  ;;  %v6568_v24 = vld [vmem:[#allocation5 + $0x228] sm:$0xff] }
  0x32   :  { %1459 = vmatpush.bf16.msra.mxu2 %v6516_v26  ;;  %v6593_v23 = vld [vmem:[#allocation5 + $0x2f0] sm:$0xff]  ;;  %v6576_v25 = vld [vmem:[#allocation5 + $0x268] sm:$0xff]  ;;  %v6574_v33 = vld [vmem:[#allocation5 + $0x258] sm:$0xff] }
  0x33   :  { %1472 = vmatpush.bf16.msra.mxu3 %v6524_v27  ;;  %v6584_v26 = vld [vmem:[#allocation5 + $0x2a8] sm:$0xff]  ;;  %v6582_v34 = vld [vmem:[#allocation5 + $0x298] sm:$0xff]  ;;  %v6565_v36 = vld [vmem:[#allocation5 + $0x210] sm:$0xff] }
  0x34   :  { %1434 = vmatpush.bf16.msra.mxu0 %v6499_v28  ;;  %v6592_v27 = vld [vmem:[#allocation5 + $0x2e8] sm:$0xff]  ;;  %v6567_v28 = vld [vmem:[#allocation5 + $0x220] sm:$0xff]  ;;  %v6573_v37 = vld [vmem:[#allocation5 + $0x250] sm:$0xff] }
  0x35   :  { %1447 = vmatpush.bf16.msra.mxu1 %v6507_v29  ;;  %v6575_v29 = vld [vmem:[#allocation5 + $0x260] sm:$0xff]  ;;  %v6606_v9 = vld [vmem:[#allocation5 + $0x358] sm:$0xff]  ;;  %v6597_v12 = vld [vmem:[#allocation5 + $0x310] sm:$0xff] }
  0x36   :  { %1460 = vmatpush.bf16.msra.mxu2 %v6515_v30  ;;  %v6583_v30 = vld [vmem:[#allocation5 + $0x2a0] sm:$0xff]  ;;  %v6614_v10 = vld [vmem:[#allocation5 + $0x398] sm:$0xff]  ;;  %v6605_v13 = vld [vmem:[#allocation5 + $0x350] sm:$0xff] }
  0x37   :  { %1473 = vmatpush.bf16.msra.mxu3 %v6523_v31  ;;  %1435 = vmatmul.bf16.vlgmr.msra.gmra.mxu0 %v123_v41  ;;  %v6591_v31 = vld [vmem:[#allocation5 + $0x2e0] sm:$0xff]  ;;  %v6572_v41 = vld [vmem:[#allocation5 + $0x248] sm:$0xff] }
  0x38   :  { %1479 = vmatpush.bf16.msrb.mxu0 %v6538_v32  ;;  %1448 = vmatmul.bf16.vlgmr.msra.gmra.mxu1 %v124_v43  ;;  %v6566_v32 = vld [vmem:[#allocation5 + $0x218] sm:$0xff]  ;;  %v6588_v43 = vld [vmem:[#allocation5 + $0x2c8] sm:$0xff] }
  0x39   :  { %1492 = vmatpush.bf16.msrb.mxu1 %v6546_v35  ;;  %1461 = vmatmul.bf16.vlgmr.msra.gmra.mxu2 %v125_v40  ;;  %v6590_v35 = vld [vmem:[#allocation5 + $0x2d8] sm:$0xff]  ;;  %v6564_v40 = vld [vmem:[#allocation5 + $0x208] sm:$0xff] }
  0x3a   :  { %1505 = vmatpush.bf16.msrb.mxu2 %v6554_v38  ;;  %1474 = vmatmul.bf16.vlgmr.msra.gmra.mxu3 %v126_v42  ;;  %v6581_v38 = vld [vmem:[#allocation5 + $0x290] sm:$0xff]  ;;  %v6580_v42 = vld [vmem:[#allocation5 + $0x288] sm:$0xff] }
  0x3b   :  { %1518 = vmatpush.bf16.msrb.mxu3 %v6562_v39  ;;  %v6589_v39 = vld [vmem:[#allocation5 + $0x2d0] sm:$0xff] }
  0x3c   :  { %1480 = vmatpush.bf16.msrb.mxu0 %v6537_v44  ;;  %v6563_v44 = vld [vmem:[#allocation5 + $0x200] sm:$0xff] }
  0x3d   :  { %1493 = vmatpush.bf16.msrb.mxu1 %v6545_v45  ;;  %v6571_v45 = vld [vmem:[#allocation5 + $0x240] sm:$0xff] }
  0x3e   :  { %1506 = vmatpush.bf16.msrb.mxu2 %v6553_v46  ;;  %v6579_v46 = vld [vmem:[#allocation5 + $0x280] sm:$0xff] }
  0x3f   :  { %1519 = vmatpush.bf16.msrb.mxu3 %v6561_v47  ;;  %v6587_v47 = vld [vmem:[#allocation5 + $0x2c0] sm:$0xff] }
  0x40   :  { %1481 = vmatpush.bf16.msrb.mxu0 %v6536_v48  ;;  %v6602_v48 = vld [vmem:[#allocation5 + $0x338] sm:$0xff] }
  0x41   :  { %1494 = vmatpush.bf16.msrb.mxu1 %v6544_v49  ;;  %v111_v49 = vld [vmem:[#allocation2 + $0x40] sm:$0xff] }
  0x42   :  { %1507 = vmatpush.bf16.msrb.mxu2 %v6552_v50  ;;  %v113_v50 = vld [vmem:[#allocation2 + $0x50] sm:$0xff] }
  0x43   :  { %1520 = vmatpush.bf16.msrb.mxu3 %v6560_v51  ;;  %v6610_v51 = vld [vmem:[#allocation5 + $0x378] sm:$0xff] }
  0x44   :  { %1482 = vmatpush.bf16.msrb.mxu0 %v6535_v52  ;;  %v112_v52 = vld [vmem:[#allocation2 + $0x48] sm:$0xff] }
  0x45   :  { %1495 = vmatpush.bf16.msrb.mxu1 %v6543_v53  ;;  %v114_v53 = vld [vmem:[#allocation2 + $0x58] sm:$0xff] }
  0x46   :  { %1508 = vmatpush.bf16.msrb.mxu2 %v6551_v54  ;;  %v6618_v54 = vld [vmem:[#allocation5 + $0x3b8] sm:$0xff] }
  0x47   :  { %1521 = vmatpush.bf16.msrb.mxu3 %v6559_v55  ;;  %v6626_v55 = vld [vmem:[#allocation5 + $0x3f8] sm:$0xff] }
  0x48   :  { %1483 = vmatpush.bf16.msrb.mxu0 %v6534_v56  ;;  %v131_v56 = vpack.c.bf16 %v111_v49, %v111_v49  ;;  %v6638_v49 = vld [vmem:[#allocation5 + $0x458] sm:$0xff] }
  0x49   :  { %1496 = vmatpush.bf16.msrb.mxu1 %v6542_v57  ;;  %v133_v57 = vpack.c.bf16 %v113_v50, %v113_v50  ;;  %v6646_v50 = vld [vmem:[#allocation5 + $0x498] sm:$0xff] }
  0x4a   :  { %1509 = vmatpush.bf16.msrb.mxu2 %v6550_v58  ;;  %v132_v58 = vpack.c.bf16 %v112_v52, %v112_v52  ;;  %v6629_v52 = vld [vmem:[#allocation5 + $0x410] sm:$0xff] }
  0x4b   :  { %1522 = vmatpush.bf16.msrb.mxu3 %v6558_v59  ;;  %v134_v59 = vpack.c.bf16 %v114_v53, %v114_v53  ;;  %v6637_v53 = vld [vmem:[#allocation5 + $0x450] sm:$0xff] }
  0x4c   :  { %1484 = vmatpush.bf16.msrb.mxu0 %v6533_v60  ;;  %v6601_v60 = vld [vmem:[#allocation5 + $0x330] sm:$0xff] }
  0x4d   :  { %1497 = vmatpush.bf16.msrb.mxu1 %v6541_v61  ;;  %v6609_v61 = vld [vmem:[#allocation5 + $0x370] sm:$0xff] }
  0x4e   :  { %1510 = vmatpush.bf16.msrb.mxu2 %v6549_v62  ;;  %v6617_v62 = vld [vmem:[#allocation5 + $0x3b0] sm:$0xff] }
  0x4f   :  { %1523 = vmatpush.bf16.msrb.mxu3 %v6557_v63  ;;  %v6625_v63 = vld [vmem:[#allocation5 + $0x3f0] sm:$0xff] }
  0x50   :  { %1485 = vmatpush.bf16.msrb.mxu0 %v6532_v0  ;;  %v6600_v0 = vld [vmem:[#allocation5 + $0x328] sm:$0xff] }
  0x51   :  { %1498 = vmatpush.bf16.msrb.mxu1 %v6540_v1  ;;  %v6608_v1 = vld [vmem:[#allocation5 + $0x368] sm:$0xff] }
  0x52   :  { %1511 = vmatpush.bf16.msrb.mxu2 %v6548_v2  ;;  %v6616_v2 = vld [vmem:[#allocation5 + $0x3a8] sm:$0xff] }
  0x53   :  { %1524 = vmatpush.bf16.msrb.mxu3 %v6556_v3  ;;  %v6624_v3 = vld [vmem:[#allocation5 + $0x3e8] sm:$0xff] }
  0x54   :  { %1486 = vmatpush.bf16.msrb.mxu0 %v6531_v4  ;;  %v6599_v4 = vld [vmem:[#allocation5 + $0x320] sm:$0xff] }
  0x55   :  { %1499 = vmatpush.bf16.msrb.mxu1 %v6539_v5  ;;  %v6607_v5 = vld [vmem:[#allocation5 + $0x360] sm:$0xff] }
  0x56   :  { %1512 = vmatpush.bf16.msrb.mxu2 %v6547_v6  ;;  %v6615_v6 = vld [vmem:[#allocation5 + $0x3a0] sm:$0xff] }
  0x57   :  { %1525 = vmatpush.bf16.msrb.mxu3 %v6555_v7  ;;  %1487 = vmatmul.bf16.vlgmr.msrb.gmra.mxu0 %v127_v17  ;;  %v6623_v7 = vld [vmem:[#allocation5 + $0x3e0] sm:$0xff]  ;;  %v6604_v17 = vld [vmem:[#allocation5 + $0x348] sm:$0xff] }
  0x58   :  { %1531 = vmatpush.bf16.msra.mxu0 %v6570_v8  ;;  %1500 = vmatmul.bf16.vlgmr.msrb.gmra.mxu1 %v128_v19  ;;  %v6598_v8 = vld [vmem:[#allocation5 + $0x318] sm:$0xff]  ;;  %v6620_v19 = vld [vmem:[#allocation5 + $0x3c8] sm:$0xff] }
  0x59   :  { %1544 = vmatpush.bf16.msra.mxu1 %v6578_v11  ;;  %1513 = vmatmul.bf16.vlgmr.msrb.gmra.mxu2 %v129_v16  ;;  %v6622_v11 = vld [vmem:[#allocation5 + $0x3d8] sm:$0xff]  ;;  %v6596_v16 = vld [vmem:[#allocation5 + $0x308] sm:$0xff] }
  0x5a   :  { %1557 = vmatpush.bf16.msra.mxu2 %v6586_v14  ;;  %1526 = vmatmul.bf16.vlgmr.msrb.gmra.mxu3 %v130_v18  ;;  %v6613_v14 = vld [vmem:[#allocation5 + $0x390] sm:$0xff]  ;;  %v6612_v18 = vld [vmem:[#allocation5 + $0x388] sm:$0xff] }
  0x5b   :  { %1570 = vmatpush.bf16.msra.mxu3 %v6594_v15  ;;  %v6621_v15 = vld [vmem:[#allocation5 + $0x3d0] sm:$0xff] }
  0x5c   :  { %1532 = vmatpush.bf16.msra.mxu0 %v6569_v20  ;;  %v6595_v20 = vld [vmem:[#allocation5 + $0x300] sm:$0xff] }
  0x5d   :  { %1545 = vmatpush.bf16.msra.mxu1 %v6577_v21  ;;  %v6603_v21 = vld [vmem:[#allocation5 + $0x340] sm:$0xff] }
  0x5e   :  { %1558 = vmatpush.bf16.msra.mxu2 %v6585_v22  ;;  %v6611_v22 = vld [vmem:[#allocation5 + $0x380] sm:$0xff] }
  0x5f   :  { %1571 = vmatpush.bf16.msra.mxu3 %v6593_v23  ;;  %v6619_v23 = vld [vmem:[#allocation5 + $0x3c0] sm:$0xff] }
  0x60   :  { %1533 = vmatpush.bf16.msra.mxu0 %v6568_v24  ;;  %v6634_v24 = vld [vmem:[#allocation5 + $0x438] sm:$0xff] }
  0x61   :  { %1546 = vmatpush.bf16.msra.mxu1 %v6576_v25  ;;  %v115_v25 = vld [vmem:[#allocation2 + $0x60] sm:$0xff] }
  0x62   :  { %1559 = vmatpush.bf16.msra.mxu2 %v6584_v26  ;;  %v117_v26 = vld [vmem:[#allocation2 + $0x70] sm:$0xff] }
  0x63   :  { %1572 = vmatpush.bf16.msra.mxu3 %v6592_v27  ;;  %v6642_v27 = vld [vmem:[#allocation5 + $0x478] sm:$0xff] }
  0x64   :  { %1534 = vmatpush.bf16.msra.mxu0 %v6567_v28  ;;  %v116_v28 = vld [vmem:[#allocation2 + $0x68] sm:$0xff] }
  0x65   :  { %1547 = vmatpush.bf16.msra.mxu1 %v6575_v29  ;;  %v118_v29 = vld [vmem:[#allocation2 + $0x78] sm:$0xff] }
  0x66   :  { %1560 = vmatpush.bf16.msra.mxu2 %v6583_v30  ;;  %v6650_v30 = vld [vmem:[#allocation5 + $0x4b8] sm:$0xff] }
  0x67   :  { %1573 = vmatpush.bf16.msra.mxu3 %v6591_v31  ;;  %v6658_v31 = vld [vmem:[#allocation5 + $0x4f8] sm:$0xff] }
  0x68   :  { %1535 = vmatpush.bf16.msra.mxu0 %v6566_v32  ;;  %v135_v32 = vpack.c.bf16 %v115_v25, %v115_v25 }
  0x69   :  { %1548 = vmatpush.bf16.msra.mxu1 %v6574_v33  ;;  %v137_v33 = vpack.c.bf16 %v117_v26, %v117_v26 }
  0x6a   :  { %1561 = vmatpush.bf16.msra.mxu2 %v6582_v34  ;;  %v136_v34 = vpack.c.bf16 %v116_v28, %v116_v28 }
  0x6b   :  { %1574 = vmatpush.bf16.msra.mxu3 %v6590_v35  ;;  %v138_v35 = vpack.c.bf16 %v118_v29, %v118_v29 }
  0x6c   :  { %1536 = vmatpush.bf16.msra.mxu0 %v6565_v36  ;;  %v6633_v36 = vld [vmem:[#allocation5 + $0x430] sm:$0xff] }
  0x6d   :  { %1549 = vmatpush.bf16.msra.mxu1 %v6573_v37  ;;  %v6641_v37 = vld [vmem:[#allocation5 + $0x470] sm:$0xff] }
  0x6e   :  { %1562 = vmatpush.bf16.msra.mxu2 %v6581_v38  ;;  %v6649_v38 = vld [vmem:[#allocation5 + $0x4b0] sm:$0xff] }
  0x6f   :  { %1575 = vmatpush.bf16.msra.mxu3 %v6589_v39  ;;  %v6657_v39 = vld [vmem:[#allocation5 + $0x4f0] sm:$0xff] }
  0x70   :  { %1537 = vmatpush.bf16.msra.mxu0 %v6564_v40  ;;  %v6632_v40 = vld [vmem:[#allocation5 + $0x428] sm:$0xff] }
  0x71   :  { %1550 = vmatpush.bf16.msra.mxu1 %v6572_v41  ;;  %v6640_v41 = vld [vmem:[#allocation5 + $0x468] sm:$0xff] }
  0x72   :  { %1563 = vmatpush.bf16.msra.mxu2 %v6580_v42  ;;  %v6648_v42 = vld [vmem:[#allocation5 + $0x4a8] sm:$0xff] }
  0x73   :  { %1576 = vmatpush.bf16.msra.mxu3 %v6588_v43  ;;  %v6656_v43 = vld [vmem:[#allocation5 + $0x4e8] sm:$0xff] }
  0x74   :  { %1538 = vmatpush.bf16.msra.mxu0 %v6563_v44  ;;  %v6631_v44 = vld [vmem:[#allocation5 + $0x420] sm:$0xff] }
  0x75   :  { %1551 = vmatpush.bf16.msra.mxu1 %v6571_v45  ;;  %v6639_v45 = vld [vmem:[#allocation5 + $0x460] sm:$0xff] }
  0x76   :  { %1564 = vmatpush.bf16.msra.mxu2 %v6579_v46  ;;  %v6647_v46 = vld [vmem:[#allocation5 + $0x4a0] sm:$0xff] }
  0x77   :  { %1577 = vmatpush.bf16.msra.mxu3 %v6587_v47  ;;  %1539 = vmatmul.bf16.vlgmr.msra.gmra.mxu0 %v131_v56  ;;  %v6655_v47 = vld [vmem:[#allocation5 + $0x4e0] sm:$0xff]  ;;  %v6628_v56 = vld [vmem:[#allocation5 + $0x408] sm:$0xff] }
  0x78   :  { %1583 = vmatpush.bf16.msrb.mxu0 %v6602_v48  ;;  %1552 = vmatmul.bf16.vlgmr.msra.gmra.mxu1 %v132_v58  ;;  %v6630_v48 = vld [vmem:[#allocation5 + $0x418] sm:$0xff]  ;;  %v6644_v58 = vld [vmem:[#allocation5 + $0x488] sm:$0xff] }
  0x79   :  { %1596 = vmatpush.bf16.msrb.mxu1 %v6610_v51  ;;  %1565 = vmatmul.bf16.vlgmr.msra.gmra.mxu2 %v133_v57  ;;  %v6654_v51 = vld [vmem:[#allocation5 + $0x4d8] sm:$0xff]  ;;  %v6636_v57 = vld [vmem:[#allocation5 + $0x448] sm:$0xff] }
  0x7a   :  { %1609 = vmatpush.bf16.msrb.mxu2 %v6618_v54  ;;  %1578 = vmatmul.bf16.vlgmr.msra.gmra.mxu3 %v134_v59  ;;  %v6645_v54 = vld [vmem:[#allocation5 + $0x490] sm:$0xff]  ;;  %v6652_v59 = vld [vmem:[#allocation5 + $0x4c8] sm:$0xff] }
  0x7b   :  { %1622 = vmatpush.bf16.msrb.mxu3 %v6626_v55  ;;  %v6653_v55 = vld [vmem:[#allocation5 + $0x4d0] sm:$0xff] }
  0x7c   :  { %1584 = vmatpush.bf16.msrb.mxu0 %v6601_v60  ;;  %v6627_v60 = vld [vmem:[#allocation5 + $0x400] sm:$0xff] }
  0x7d   :  { %1597 = vmatpush.bf16.msrb.mxu1 %v6609_v61  ;;  %v6635_v61 = vld [vmem:[#allocation5 + $0x440] sm:$0xff] }
  0x7e   :  { %1610 = vmatpush.bf16.msrb.mxu2 %v6617_v62  ;;  %v6643_v62 = vld [vmem:[#allocation5 + $0x480] sm:$0xff] }
  0x7f   :  { %1623 = vmatpush.bf16.msrb.mxu3 %v6625_v63  ;;  %v119_v63 = vld [vmem:[#allocation2 + $0x80] sm:$0xff] }
  0x80   :  { %1585 = vmatpush.bf16.msrb.mxu0 %v6600_v0  ;;  %v120_v0 = vld [vmem:[#allocation2 + $0x88] sm:$0xff] }
  0x81   :  { %1598 = vmatpush.bf16.msrb.mxu1 %v6608_v1  ;;  %v6651_v1 = vld [vmem:[#allocation5 + $0x4c0] sm:$0xff] }
  0x82   :  { %1611 = vmatpush.bf16.msrb.mxu2 %v6616_v2  ;;  %v121_v2 = vld [vmem:[#allocation2 + $0x90] sm:$0xff] }
  0x83   :  { %1624 = vmatpush.bf16.msrb.mxu3 %v6624_v3  ;;  %v122_v3 = vld [vmem:[#allocation2 + $0x98] sm:$0xff] }
  0x84   :  { %1586 = vmatpush.bf16.msrb.mxu0 %v6599_v4  ;;  %v139_v4 = vpack.c.bf16 %v119_v63, %v119_v63  ;;  %v5303_v63 = vld [vmem:[#allocation7 + $0xb0] sm:$0xf0] }
  0x85   :  { %1599 = vmatpush.bf16.msrb.mxu1 %v6607_v5  ;;  %v140_v5 = vpack.c.bf16 %v120_v0, %v120_v0  ;;  %v5309_v0 = vld [vmem:[#allocation7 + $0xa8] sm:$0xf] }
  0x86   :  { %1612 = vmatpush.bf16.msrb.mxu2 %v6615_v6  ;;  %v141_v6 = vpack.c.bf16 %v121_v2, %v121_v2 }
  0x87   :  { %1625 = vmatpush.bf16.msrb.mxu3 %v6623_v7  ;;  %v142_v7 = vpack.c.bf16 %v122_v3, %v122_v3 }
  0x88   :  { %1587 = vmatpush.bf16.msrb.mxu0 %v6598_v8  ;;  %v6989_v8 = vld [vmem:[%s7307_s2] ss:$0 sm:$0xff] }
  0x89   :  { %1600 = vmatpush.bf16.msrb.mxu1 %v6606_v9 }
  0x8a   :  { %1613 = vmatpush.bf16.msrb.mxu2 %v6614_v10 }
  0x8b   :  { %1626 = vmatpush.bf16.msrb.mxu3 %v6622_v11 }
  0x8c   :  { %1588 = vmatpush.bf16.msrb.mxu0 %v6597_v12 }
  0x8d   :  { %1601 = vmatpush.bf16.msrb.mxu1 %v6605_v13 }
  0x8e   :  { %1614 = vmatpush.bf16.msrb.mxu2 %v6613_v14 }
  0x8f   :  { %1627 = vmatpush.bf16.msrb.mxu3 %v6621_v15 }
  0x90   :  { %1589 = vmatpush.bf16.msrb.mxu0 %v6596_v16 }
  0x91   :  { %1602 = vmatpush.bf16.msrb.mxu1 %v6604_v17 }
  0x92   :  { %1615 = vmatpush.bf16.msrb.mxu2 %v6612_v18 }
  0x93   :  { %1628 = vmatpush.bf16.msrb.mxu3 %v6620_v19 }
  0x94   :  { %1590 = vmatpush.bf16.msrb.mxu0 %v6595_v20 }
  0x95   :  { %1603 = vmatpush.bf16.msrb.mxu1 %v6603_v21 }
  0x96   :  { %1616 = vmatpush.bf16.msrb.mxu2 %v6611_v22 }
  0x97   :  { %1629 = vmatpush.bf16.msrb.mxu3 %v6619_v23  ;;  %1591 = vmatmul.bf16.vlgmr.msrb.gmra.mxu0 %v135_v32 }
  0x98   :  { %1635 = vmatpush.bf16.msra.mxu0 %v6634_v24  ;;  %1604 = vmatmul.bf16.vlgmr.msrb.gmra.mxu1 %v136_v34  ;;  %v6689_v34 = vld [vmem:[#allocation7 + $0xec] sm:$0xf0] }
  0x99   :  { %1648 = vmatpush.bf16.msra.mxu1 %v6642_v27  ;;  %1617 = vmatmul.bf16.vlgmr.msrb.gmra.mxu2 %v137_v33  ;;  %v5333_v33 = vld [vmem:[#allocation7 + $0xe0] sm:$0xf] }
  0x9a   :  { %1661 = vmatpush.bf16.msra.mxu2 %v6650_v30  ;;  %1630 = vmatmul.bf16.vlgmr.msrb.gmra.mxu3 %v138_v35  ;;  %v6687_v35 = vld [vmem:[#allocation7 + $0xe4] sm:$0xf] }
  0x9b   :  { %1674 = vmatpush.bf16.msra.mxu3 %v6658_v31 }
  0x9c   :  { %1636 = vmatpush.bf16.msra.mxu0 %v6633_v36  ;;  %v5334_v36 = vor.u32 %v6689_v34, %v5333_v33  ;;  %v5279_v34 = vld [vmem:[#allocation7 + $0x78] sm:$0xf0] }
  0x9d   :  { %1649 = vmatpush.bf16.msra.mxu1 %v6641_v37  ;;  %v5335_v37 = vld [vmem:[#allocation7 + $0xf0] sm:$0xf0] }
  0x9e   :  { %1662 = vmatpush.bf16.msra.mxu2 %v6649_v38  ;;  %v5341_v38 = vld [vmem:[#allocation7 + $0xe8] sm:$0xf] }
  0x9f   :  { %1675 = vmatpush.bf16.msra.mxu3 %v6657_v39  ;;  %v6690_v39 = vld [vmem:[#allocation7 + $0xf4] sm:$0xf0] }
  0xa0   :  { %1637 = vmatpush.bf16.msra.mxu0 %v6632_v40  ;;  %v5338_v40 = vor.u32 %v6687_v35, %v5335_v37  ;;  %v5253_v35 = vld [vmem:[#allocation7 + $0x40] sm:$0xf] }
  0xa1   :  { %1650 = vmatpush.bf16.msra.mxu1 %v6640_v41  ;;  %v5342_v41 = vor.u32 %v6690_v39, %v5341_v38  ;;  %v6667_v38 = vld [vmem:[#allocation7 + $0x44] sm:$0xf]  ;;  %v5255_v39 = vld [vmem:[#allocation7 + $0x50] sm:$0xf0] }
  0xa2   :  { %1663 = vmatpush.bf16.msra.mxu2 %v6648_v42  ;;  %v6688_v42 = vld [vmem:[#allocation7 + $0xec] sm:$0xf] }
  0xa3   :  { %1676 = vmatpush.bf16.msra.mxu3 %v6656_v43  ;;  %v5343_v43 = vld [vmem:[#allocation7 + $0xf8] sm:$0xf0] }
  0xa4   :  { %1638 = vmatpush.bf16.msra.mxu0 %v6631_v44  ;;  %v5346_v44 = vor.u32 %v6688_v42, %v5343_v43  ;;  %v6670_v42 = vld [vmem:[#allocation7 + $0x54] sm:$0xf0]  ;;  %v6668_v43 = vld [vmem:[#allocation7 + $0x4c] sm:$0xf] }
  0xa5   :  { %1651 = vmatpush.bf16.msra.mxu1 %v6639_v45 }
  0xa6   :  { %1664 = vmatpush.bf16.msra.mxu2 %v6647_v46  ;;  %v5317_v46 = vld [vmem:[#allocation7 + $0xc0] sm:$0xf] }
  0xa7   :  { %1677 = vmatpush.bf16.msra.mxu3 %v6655_v47  ;;  %v6685_v47 = vld [vmem:[#allocation7 + $0xcc] sm:$0xf0] }
  0xa8   :  { %1639 = vmatpush.bf16.msra.mxu0 %v6630_v48  ;;  %v6683_v48 = vld [vmem:[#allocation7 + $0xc4] sm:$0xf] }
  0xa9   :  { %1652 = vmatpush.bf16.msra.mxu1 %v6638_v49 }
  0xaa   :  { %1665 = vmatpush.bf16.msra.mxu2 %v6646_v50  ;;  %v5318_v50 = vor.u32 %v6685_v47, %v5317_v46 }
  0xab   :  { %1678 = vmatpush.bf16.msra.mxu3 %v6654_v51  ;;  %v5319_v51 = vld [vmem:[#allocation7 + $0xd0] sm:$0xf0] }
  0xac   :  { %1640 = vmatpush.bf16.msra.mxu0 %v6629_v52  ;;  %v5325_v52 = vld [vmem:[#allocation7 + $0xc8] sm:$0xf] }
  0xad   :  { %1653 = vmatpush.bf16.msra.mxu1 %v6637_v53  ;;  %v6686_v53 = vld [vmem:[#allocation7 + $0xd4] sm:$0xf0] }
  0xae   :  { %1666 = vmatpush.bf16.msra.mxu2 %v6645_v54  ;;  %v5322_v54 = vor.u32 %v6683_v48, %v5319_v51  ;;  %v5258_v48 = vor.u32 %v6667_v38, %v5255_v39  ;;  %v5237_v51 = vld [vmem:[#allocation7 + $0x20] sm:$0xf]  ;;  %v6748_v38 = vld [vmem:[#allocation7 + $0x1cc] sm:$0xf]  ;;  %v5455_v39 = vld [vmem:[#allocation7 + $0x1d8] sm:$0xf0] }
  0xaf   :  { %1679 = vmatpush.bf16.msra.mxu3 %v6653_v55  ;;  %v5326_v55 = vor.u32 %v6686_v53, %v5325_v52  ;;  %v6665_v52 = vld [vmem:[#allocation7 + $0x2c] sm:$0xf0]  ;;  %v6663_v53 = vld [vmem:[#allocation7 + $0x24] sm:$0xf] }
  0xb0   :  { %1641 = vmatpush.bf16.msra.mxu0 %v6628_v56  ;;  %v6684_v56 = vld [vmem:[#allocation7 + $0xcc] sm:$0xf] }
  0xb1   :  { %1654 = vmatpush.bf16.msra.mxu1 %v6636_v57  ;;  %v5327_v57 = vld [vmem:[#allocation7 + $0xd8] sm:$0xf0] }
  0xb2   :  { %1667 = vmatpush.bf16.msra.mxu2 %v6644_v58  ;;  %v5330_v58 = vor.u32 %v6684_v56, %v5327_v57  ;;  %v5245_v56 = vld [vmem:[#allocation7 + $0x28] sm:$0xf]  ;;  %v6666_v57 = vld [vmem:[#allocation7 + $0x34] sm:$0xf0] }
  0xb3   :  { %1680 = vmatpush.bf16.msra.mxu3 %v6652_v59  ;;  %v5301_v59 = vld [vmem:[#allocation7 + $0xa0] sm:$0xf] }
  0xb4   :  { %1642 = vmatpush.bf16.msra.mxu0 %v6627_v60  ;;  %v1436_v9 = vpop.f32.mrf.mxu0  ;;  %v6681_v60 = vld [vmem:[#allocation7 + $0xac] sm:$0xf0] }
  0xb5   :  { %1655 = vmatpush.bf16.msra.mxu1 %v6635_v61  ;;  %v1437_v10 = vadd.f32 %v6989_v8, %v1436_v9  ;;  %v1449_v11 = vpop.f32.mrf.mxu1  ;;  %v6679_v61 = vld [vmem:[#allocation7 + $0xa4] sm:$0xf]  ;;  %v5285_v9 = vld [vmem:[#allocation7 + $0x80] sm:$0xf] }
  0xb6   :  { %1668 = vmatpush.bf16.msra.mxu2 %v6643_v62  ;;  %v5302_v62 = vor.u32 %v6681_v60, %v5301_v59  ;;  %v5306_v3 = vor.u32 %v6679_v61, %v5303_v63  ;;  %v5247_v59 = vld [vmem:[#allocation7 + $0x38] sm:$0xf0]  ;;  %v5238_v60 = vor.u32 %v6665_v52, %v5237_v51  ;;  %v5221_v63 = vld [vmem:[#allocation7] sm:$0xf]  ;;  %v6744_v52 = vld [vmem:[#allocation7 + $0x1ac] sm:$0xf] }
  0xb7   :  { %1681 = vmatpush.bf16.msra.mxu3 %v6651_v1  ;;  %1643 = vmatmul.bf16.vlgmr.msra.gmra.mxu0 %v139_v4  ;;  %v1450_v12 = vadd.f32 %v1449_v11, %v1437_v10  ;;  %v6682_v1 = vld [vmem:[#allocation7 + $0xb4] sm:$0xf0]  ;;  %v6677_v10 = vld [vmem:[#allocation7 + $0x8c] sm:$0xf0]  ;;  %v6675_v11 = vld [vmem:[#allocation7 + $0x84] sm:$0xf] }
  0xb8   :  { %1656 = vmatmul.bf16.vlgmr.msra.gmra.mxu1 %v140_v5  ;;  %1891 = vmatpush.bf16.msrb.mxu0 %v5334_v36  ;;  %v5310_v4 = vor.u32 %v6682_v1, %v5309_v0  ;;  %v6680_v5 = vld [vmem:[#allocation7 + $0xac] sm:$0xf]  ;;  %v6669_v36 = vld [vmem:[#allocation7 + $0x4c] sm:$0xf0]  ;;  %v6659_v1 = vld [vmem:[#allocation7 + $0x4] sm:$0xf] }
  0xb9   :  { %1669 = vmatmul.bf16.vlgmr.msra.gmra.mxu2 %v141_v6  ;;  %1904 = vmatpush.bf16.msrb.mxu1 %v5338_v40  ;;  %v5311_v6 = vld [vmem:[#allocation7 + $0xb8] sm:$0xf0]  ;;  %v5261_v40 = vld [vmem:[#allocation7 + $0x48] sm:$0xf]  ;;  %v5254_v47 = vor.u32 %v6669_v36, %v5253_v35  ;;  %v6661_v0 = vld [vmem:[#allocation7 + $0xc] sm:$0xf0] }
  0xba   :  { %1682 = vmatmul.bf16.vlgmr.msra.gmra.mxu3 %v142_v7  ;;  %1917 = vmatpush.bf16.msrb.mxu2 %v5342_v41  ;;  %v5314_v8 = vor.u32 %v6680_v5, %v5311_v6  ;;  %v5229_v5 = vld [vmem:[#allocation7 + $0x8] sm:$0xf]  ;;  %v6662_v6 = vld [vmem:[#allocation7 + $0x14] sm:$0xf0] }
  0xbb   :  { %1930 = vmatpush.bf16.msrb.mxu3 %v5346_v44  ;;  %v5263_v44 = vld [vmem:[#allocation7 + $0x58] sm:$0xf0] }
  0xbc   :  { %v1462_v13 = vpop.f32.mrf.mxu2  ;;  %v1438_v16 = vpop.f32.mrf.mxu0  ;;  %1892 = vmatpush.bf16.msrb.mxu0 %v5318_v50  ;;  %v5262_v50 = vor.u32 %v6670_v42, %v5261_v40  ;;  %v5458_v40 = vor.u32 %v6748_v38, %v5455_v39  ;;  %v6745_v42 = vld [vmem:[#allocation7 + $0x1ac] sm:$0xf0] }
  0xbd   :  { %v1463_v14 = vadd.f32 %v1462_v13, %v1450_v12  ;;  %v1475_v15 = vpop.f32.mrf.mxu3  ;;  %v1451_v18 = vpop.f32.mrf.mxu1  ;;  %1905 = vmatpush.bf16.msrb.mxu1 %v5322_v54  ;;  %v5286_v13 = vor.u32 %v6677_v10, %v5285_v9  ;;  %v6678_v16 = vld [vmem:[#allocation7 + $0x94] sm:$0xf0]  ;;  %v5266_v54 = vor.u32 %v6668_v43, %v5263_v44  ;;  %v5231_v9 = vld [vmem:[#allocation7 + $0x18] sm:$0xf0]  ;;  %v5222_v10 = vor.u32 %v6661_v0, %v5221_v63  ;;  %v6743_v43 = vld [vmem:[#allocation7 + $0x1a4] sm:$0xf] }
  0xbe   :  { %1918 = vmatpush.bf16.msrb.mxu2 %v5326_v55  ;;  %v5239_v55 = vld [vmem:[#allocation7 + $0x30] sm:$0xf0]  ;;  %v5421_v0 = vld [vmem:[#allocation7 + $0x188] sm:$0xf]  ;;  %v6729_v38 = vld [vmem:[#allocation7 + $0x12c] sm:$0xf0] }
  0xbf   :  { %v1476_v17 = vadd.f32 %v1475_v15, %v1463_v14  ;;  %1931 = vmatpush.bf16.msrb.mxu3 %v5330_v58  ;;  %v5287_v14 = vld [vmem:[#allocation7 + $0x90] sm:$0xf0]  ;;  %v5293_v15 = vld [vmem:[#allocation7 + $0x88] sm:$0xf]  ;;  %v6664_v58 = vld [vmem:[#allocation7 + $0x2c] sm:$0xf]  ;;  %v5242_v61 = vor.u32 %v6663_v53, %v5239_v55 }
  0xc0   :  { %1893 = vmatpush.bf16.msrb.mxu0 %v5302_v62  ;;  %v5290_v18 = vor.u32 %v6675_v11, %v5287_v14  ;;  %v5246_v62 = vor.u32 %v6666_v57, %v5245_v56  ;;  %v5461_v14 = vld [vmem:[#allocation7 + $0x1e0] sm:$0xf]  ;;  %v5439_v53 = vld [vmem:[#allocation7 + $0x1b8] sm:$0xf0]  ;;  %v5415_v63 = vld [vmem:[#allocation7 + $0x190] sm:$0xf0] }
  0xc1   :  { %1906 = vmatpush.bf16.msrb.mxu1 %v5306_v3  ;;  %v5250_v3 = vor.u32 %v6664_v58, %v5247_v59  ;;  %v5442_v55 = vor.u32 %v6744_v52, %v5439_v53  ;;  %v5413_v58 = vld [vmem:[#allocation7 + $0x180] sm:$0xf]  ;;  %v6741_v59 = vld [vmem:[#allocation7 + $0x18c] sm:$0xf0]  ;;  %v6723_v53 = vld [vmem:[#allocation7 + $0x104] sm:$0xf] }
  0xc2   :  { %1919 = vmatpush.bf16.msrb.mxu2 %v5310_v4  ;;  %v5223_v4 = vld [vmem:[#allocation7 + $0x10] sm:$0xf0]  ;;  %v6725_v52 = vld [vmem:[#allocation7 + $0x10c] sm:$0xf0] }
  0xc3   :  { %1932 = vmatpush.bf16.msrb.mxu3 %v5314_v8  ;;  %v6660_v8 = vld [vmem:[#allocation7 + $0xc] sm:$0xf]  ;;  %v5226_v11 = vor.u32 %v6659_v1, %v5223_v4  ;;  %v6742_v1 = vld [vmem:[#allocation7 + $0x194] sm:$0xf0] }
  0xc4   :  { %v1464_v19 = vpop.f32.mrf.mxu2  ;;  %1894 = vmatpush.bf16.msrb.mxu0 %v5286_v13  ;;  %v5234_v13 = vor.u32 %v6660_v8, %v5231_v9  ;;  %v5423_v8 = vld [vmem:[#allocation7 + $0x198] sm:$0xf0]  ;;  %v5397_v9 = vld [vmem:[#allocation7 + $0x160] sm:$0xf] }
  0xc5   :  { %v1477_v20 = vpop.f32.mrf.mxu3  ;;  %v5294_v19 = vor.u32 %v6678_v16, %v5293_v15  ;;  %1907 = vmatpush.bf16.msrb.mxu1 %v5290_v18  ;;  %v6753_v15 = vld [vmem:[#allocation7 + $0x1ec] sm:$0xf0]  ;;  %v6751_v16 = vld [vmem:[#allocation7 + $0x1e4] sm:$0xf]  ;;  %v5463_v18 = vld [vmem:[#allocation7 + $0x1f0] sm:$0xf0] }
  0xc6   :  { %v6676_v20 = vld [vmem:[#allocation7 + $0x8c] sm:$0xf] }
  0xc7   :  { %1920 = vmatpush.bf16.msrb.mxu2 %v5294_v19  ;;  %v5469_v19 = vld [vmem:[#allocation7 + $0x1e8] sm:$0xf] }
  0xd4   :  { %v1488_v21 = vpop.f32.mrf.mxu0 }
  0xd5   :  { %v1489_v22 = vadd.f32 %v1488_v21, %v1476_v17  ;;  %v1501_v23 = vpop.f32.mrf.mxu1  ;;  %v5295_v21 = vld [vmem:[#allocation7 + $0x98] sm:$0xf0] }
  0xd7   :  { %v1502_v24 = vadd.f32 %v1501_v23, %v1489_v22  ;;  %v5269_v22 = vld [vmem:[#allocation7 + $0x60] sm:$0xf]  ;;  %v5298_v23 = vor.u32 %v6676_v20, %v5295_v21  ;;  %v6754_v20 = vld [vmem:[#allocation7 + $0x1f4] sm:$0xf0]  ;;  %v5466_v21 = vor.u32 %v6751_v16, %v5463_v18 }
  0xd8   :  { %v6738_v16 = vld [vmem:[#allocation7 + $0x174] sm:$0xf0] }
  0xd9   :  { %1933 = vmatpush.bf16.msrb.mxu3 %v5298_v23  ;;  %v6752_v23 = vld [vmem:[#allocation7 + $0x1ec] sm:$0xf] }
  0xdc   :  { %v1514_v25 = vpop.f32.mrf.mxu2  ;;  %v1490_v28 = vpop.f32.mrf.mxu0 }
  0xdd   :  { %v1515_v26 = vadd.f32 %v1514_v25, %v1502_v24  ;;  %v1527_v27 = vpop.f32.mrf.mxu3  ;;  %v1503_v30 = vpop.f32.mrf.mxu1  ;;  %v6673_v24 = vld [vmem:[#allocation7 + $0x6c] sm:$0xf0]  ;;  %v6671_v25 = vld [vmem:[#allocation7 + $0x64] sm:$0xf]  ;;  %v5277_v28 = vld [vmem:[#allocation7 + $0x68] sm:$0xf] }
  0xde   :  { %v6674_v30 = vld [vmem:[#allocation7 + $0x74] sm:$0xf0] }
  0xdf   :  { %v7220_v29 = vadd.f32 %v1527_v27, %v1515_v26  ;;  %v5271_v26 = vld [vmem:[#allocation7 + $0x70] sm:$0xf0]  ;;  %v5270_v27 = vor.u32 %v6673_v24, %v5269_v22  ;;  %v5278_v33 = vor.u32 %v6674_v30, %v5277_v28  ;;  %v5470_v22 = vor.u32 %v6754_v20, %v5469_v19  ;;  %v5471_v24 = vld [vmem:[#allocation7 + $0x1f8] sm:$0xf0]  ;;  %v6747_v28 = vld [vmem:[#allocation7 + $0x1c4] sm:$0xf] }
  0xe0   :  { %v6736_v20 = vld [vmem:[#allocation7 + $0x16c] sm:$0xf] }
  0xe1   :  { %1895 = vmatpush.bf16.msrb.mxu0 %v5270_v27  ;;  %1921 = vmatpush.bf16.msrb.mxu2 %v5278_v33  ;;  %v6749_v27 = vld [vmem:[#allocation7 + $0x1cc] sm:$0xf0]  ;;  %v5453_v33 = vld [vmem:[#allocation7 + $0x1c8] sm:$0xf] }
  0xe4   :  { %v1516_v31 = vpop.f32.mrf.mxu2 }
  0xe5   :  { %v1529_v32 = vpop.f32.mrf.mxu3  ;;  %v6672_v31 = vld [vmem:[#allocation7 + $0x6c] sm:$0xf]  ;;  %1896 = vmatpush.bf16.msrb.mxu0 %v5254_v47  ;;  %1922 = vmatpush.bf16.msrb.mxu2 %v5262_v50  ;;  %v5437_v47 = vld [vmem:[#allocation7 + $0x1a8] sm:$0xf] }
  0xe6   :  { %v5274_v32 = vor.u32 %v6671_v25, %v5271_v26  ;;  %v5282_v37 = vor.u32 %v6672_v31, %v5279_v34  ;;  %v5474_v25 = vor.u32 %v6752_v23, %v5471_v24  ;;  %v5445_v26 = vld [vmem:[#allocation7 + $0x1c0] sm:$0xf]  ;;  %v6750_v34 = vld [vmem:[#allocation7 + $0x1d4] sm:$0xf0]  ;;  %v6733_v24 = vld [vmem:[#allocation7 + $0x14c] sm:$0xf0] }
  0xe7   :  { %v5446_v31 = vor.u32 %v6749_v27, %v5445_v26  ;;  %v5383_v26 = vld [vmem:[#allocation7 + $0x150] sm:$0xf0] }
  0xe8   :  { %1908 = vmatpush.bf16.msrb.mxu1 %v5274_v32  ;;  %1934 = vmatpush.bf16.msrb.mxu3 %v5282_v37  ;;  %v5447_v32 = vld [vmem:[#allocation7 + $0x1d0] sm:$0xf0]  ;;  %v5454_v37 = vor.u32 %v6750_v34, %v5453_v33 }
  0xe9   :  { %1897 = vmatpush.bf16.msrb.mxu0 %v5238_v60  ;;  %1923 = vmatpush.bf16.msrb.mxu2 %v5246_v62  ;;  %v5450_v36 = vor.u32 %v6747_v28, %v5447_v32  ;;  %v6739_v60 = vld [vmem:[#allocation7 + $0x184] sm:$0xf]  ;;  %v5414_v62 = vor.u32 %v6741_v59, %v5413_v58  ;;  %v5389_v28 = vld [vmem:[#allocation7 + $0x148] sm:$0xf]  ;;  %v6732_v32 = vld [vmem:[#allocation7 + $0x14c] sm:$0xf] }
  0xea   :  { %v5418_v4 = vor.u32 %v6739_v60, %v5415_v63  ;;  %v5357_v58 = vld [vmem:[#allocation7 + $0x108] sm:$0xf]  ;;  %v6726_v59 = vld [vmem:[#allocation7 + $0x114] sm:$0xf0]  ;;  %v6724_v60 = vld [vmem:[#allocation7 + $0x10c] sm:$0xf] }
  0xec   :  { %1909 = vmatpush.bf16.msrb.mxu1 %v5258_v48  ;;  %1935 = vmatpush.bf16.msrb.mxu3 %v5266_v54  ;;  %v6746_v48 = vld [vmem:[#allocation7 + $0x1b4] sm:$0xf0] }
  0xed   :  { %1898 = vmatpush.bf16.msrb.mxu0 %v5222_v10  ;;  %v5438_v51 = vor.u32 %v6746_v48, %v5437_v47  ;;  %v6737_v10 = vld [vmem:[#allocation7 + $0x16c] sm:$0xf0]  ;;  %v6728_v47 = vld [vmem:[#allocation7 + $0x12c] sm:$0xf]  ;;  %v5375_v48 = vld [vmem:[#allocation7 + $0x138] sm:$0xf0] }
  0xf0   :  { %1910 = vmatpush.bf16.msrb.mxu1 %v5242_v61  ;;  %1936 = vmatpush.bf16.msrb.mxu3 %v5250_v3 }
  0xf4   :  { %v7222_v45 = vpop.f32.mrf.mxu0  ;;  %1911 = vmatpush.bf16.msrb.mxu1 %v5226_v11  ;;  %1937 = vmatpush.bf16.msrb.mxu3 %v5234_v13  ;;  %v6735_v11 = vld [vmem:[#allocation7 + $0x164] sm:$0xf]  ;;  %v5398_v13 = vor.u32 %v6737_v10, %v5397_v9 }
  0xf5   :  { %v7224_v49 = vpop.f32.mrf.mxu1  ;;  %v1541_v56 = vadd.f32 %v7222_v45, %v7220_v29 }
  0xf7   :  { %v1554_v45 = vadd.f32 %v7224_v49, %v1541_v56  ;;  %v5351_v56 = vld [vmem:[#allocation7 + $0x110] sm:$0xf0] }
  0xf8   :  { %2232 = vmatpush.bf16.msra.mxu1 %v5466_v21  ;;  %2258 = vmatpush.bf16.msra.mxu3 %v5474_v25  ;;  %v5407_v21 = vld [vmem:[#allocation7 + $0x178] sm:$0xf0]  ;;  %v6731_v25 = vld [vmem:[#allocation7 + $0x144] sm:$0xf]  ;;  %v5354_v63 = vor.u32 %v6723_v53, %v5351_v56  ;;  %v6714_v53 = vld [vmem:[#allocation10 + $0xb8] sm:$0xff] }
  0xf9   :  { %v5410_v23 = vor.u32 %v6736_v20, %v5407_v21  ;;  %v5386_v27 = vor.u32 %v6731_v25, %v5383_v26  ;;  %v6769_v20 = vld [vmem:[#allocation10 + $0x170] sm:$0xff]  ;;  %v6784_v25 = vld [vmem:[#allocation10 + $0x1e8] sm:$0xff]  ;;  %v6759_v26 = vld [vmem:[#allocation10 + $0x120] sm:$0xff] }
  0xfa   :  { %v6777_v21 = vld [vmem:[#allocation10 + $0x1b0] sm:$0xff]  ;;  %v6696_v56 = vld [vmem:[#allocation10 + $0x28] sm:$0xff] }
  0xfc   :  { %v7226_v2 = vpop.f32.mrf.mxu2  ;;  %v1542_v12 = vpop.f32.mrf.mxu0  ;;  %2233 = vmatpush.bf16.msra.mxu1 %v5450_v36  ;;  %2259 = vmatpush.bf16.msra.mxu3 %v5458_v40  ;;  %v5391_v36 = vld [vmem:[#allocation7 + $0x158] sm:$0xf0]  ;;  %v6727_v40 = vld [vmem:[#allocation7 + $0x124] sm:$0xf] }
  0xfd   :  { %v7228_v7 = vpop.f32.mrf.mxu3  ;;  %v1555_v17 = vpop.f32.mrf.mxu1  ;;  %v5230_v12 = vor.u32 %v6662_v6, %v5229_v5  ;;  %v5422_v5 = vor.u32 %v6742_v1, %v5421_v0  ;;  %v6740_v6 = vld [vmem:[#allocation7 + $0x18c] sm:$0xf]  ;;  %v5394_v39 = vor.u32 %v6732_v32, %v5391_v36  ;;  %v5358_v0 = vor.u32 %v6726_v59, %v5357_v58  ;;  %v6757_v36 = vld [vmem:[#allocation10 + $0x110] sm:$0xff]  ;;  %v6704_v58 = vld [vmem:[#allocation10 + $0x68] sm:$0xff] }
  0xfe   :  { %v5462_v17 = vor.u32 %v6753_v15, %v5461_v14  ;;  %v5426_v29 = vor.u32 %v6740_v6, %v5423_v8  ;;  %v5399_v14 = vld [vmem:[#allocation7 + $0x170] sm:$0xf0]  ;;  %v5405_v15 = vld [vmem:[#allocation7 + $0x168] sm:$0xf]  ;;  %v6766_v32 = vld [vmem:[#allocation10 + $0x158] sm:$0xff] }
  0xff   :  { %1924 = vmatpush.bf16.msrb.mxu2 %v5230_v12  ;;  %v1567_v12 = vadd.f32 %v7226_v2, %v1554_v45  ;;  %v5402_v18 = vor.u32 %v6735_v11, %v5399_v14  ;;  %v5406_v19 = vor.u32 %v6738_v16, %v5405_v15  ;;  %v6762_v14 = vld [vmem:[#allocation10 + $0x138] sm:$0xff]  ;;  %v6713_v59 = vld [vmem:[#allocation10 + $0xb0] sm:$0xff] }
 0x100   :  { %2219 = vmatpush.bf16.msra.mxu0 %v5462_v17  ;;  %2260 = vmatpush.bf16.msra.mxu3 %v5442_v55  ;;  %v5378_v55 = vor.u32 %v6728_v47, %v5375_v48  ;;  %v6770_v15 = vld [vmem:[#allocation10 + $0x178] sm:$0xff] }
 0x101   :  { %v1580_v33 = vadd.f32 %v7228_v7, %v1567_v12  ;;  %v6698_v47 = vld [vmem:[#allocation10 + $0x38] sm:$0xff] }
 0x102   :  { %v6706_v48 = vld [vmem:[#allocation10 + $0x78] sm:$0xff] }
 0x103   :  { %2245 = vmatpush.bf16.msra.mxu2 %v5470_v22  ;;  %v5381_v22 = vld [vmem:[#allocation7 + $0x140] sm:$0xf] }
 0x104   :  { %v1568_v41 = vpop.f32.mrf.mxu2  ;;  %2220 = vmatpush.bf16.msra.mxu0 %v5446_v31  ;;  %2261 = vmatpush.bf16.msra.mxu3 %v5426_v29  ;;  %v5382_v2 = vor.u32 %v6733_v24, %v5381_v22  ;;  %v6734_v31 = vld [vmem:[#allocation7 + $0x154] sm:$0xf0]  ;;  %v6785_v22 = vld [vmem:[#allocation10 + $0x1f0] sm:$0xff]  ;;  %v6776_v24 = vld [vmem:[#allocation10 + $0x1a8] sm:$0xff] }
 0x105   :  { %v1581_v46 = vpop.f32.mrf.mxu3  ;;  %v5429_v41 = vld [vmem:[#allocation7 + $0x1a0] sm:$0xf]  ;;  %v5390_v34 = vor.u32 %v6734_v31, %v5389_v28  ;;  %v6783_v28 = vld [vmem:[#allocation10 + $0x1e0] sm:$0xff]  ;;  %v6758_v31 = vld [vmem:[#allocation10 + $0x118] sm:$0xff] }
 0x106   :  { %v5430_v44 = vor.u32 %v6745_v42, %v5429_v41  ;;  %v5431_v46 = vld [vmem:[#allocation7 + $0x1b0] sm:$0xf0]  ;;  %v5373_v42 = vld [vmem:[#allocation7 + $0x128] sm:$0xf] }
 0x107   :  { %2246 = vmatpush.bf16.msra.mxu2 %v5454_v37  ;;  %v5434_v50 = vor.u32 %v6743_v43, %v5431_v46  ;;  %v5365_v37 = vld [vmem:[#allocation7 + $0x120] sm:$0xf]  ;;  %v5367_v41 = vld [vmem:[#allocation7 + $0x130] sm:$0xf0]  ;;  %v6730_v46 = vld [vmem:[#allocation7 + $0x134] sm:$0xf0] }
 0x108   :  { %2221 = vmatpush.bf16.msra.mxu0 %v5430_v44  ;;  %2262 = vmatpush.bf16.msra.mxu3 %v5410_v23  ;;  %v5366_v44 = vor.u32 %v6729_v38, %v5365_v37  ;;  %v5374_v7 = vor.u32 %v6730_v46, %v5373_v42  ;;  %v6768_v23 = vld [vmem:[#allocation10 + $0x168] sm:$0xff]  ;;  %v6765_v37 = vld [vmem:[#allocation10 + $0x150] sm:$0xff]  ;;  %v6763_v46 = vld [vmem:[#allocation10 + $0x140] sm:$0xff] }
 0x109   :  { %2234 = vmatpush.bf16.msra.mxu1 %v5434_v50  ;;  %v5370_v50 = vor.u32 %v6727_v40, %v5367_v41  ;;  %v6773_v38 = vld [vmem:[#allocation10 + $0x190] sm:$0xff]  ;;  %v6756_v40 = vld [vmem:[#allocation10 + $0x108] sm:$0xff] }
 0x10a   :  { %v6764_v41 = vld [vmem:[#allocation10 + $0x148] sm:$0xff] }
 0x10b   :  { %2247 = vmatpush.bf16.msra.mxu2 %v5438_v51  ;;  %v5349_v51 = vld [vmem:[#allocation7 + $0x100] sm:$0xf] }
 0x10c   :  { %2222 = vmatpush.bf16.msra.mxu0 %v5414_v62  ;;  %2263 = vmatpush.bf16.msra.mxu3 %v5394_v39  ;;  %v5350_v62 = vor.u32 %v6725_v52, %v5349_v51  ;;  %v6781_v39 = vld [vmem:[#allocation10 + $0x1d0] sm:$0xff]  ;;  %v6772_v42 = vld [vmem:[#allocation10 + $0x188] sm:$0xff]  ;;  %v6771_v51 = vld [vmem:[#allocation10 + $0x180] sm:$0xff] }
 0x10d   :  { %2235 = vmatpush.bf16.msra.mxu1 %v5418_v4  ;;  %v6779_v52 = vld [vmem:[#allocation10 + $0x1c0] sm:$0xff] }
 0x10f   :  { %2248 = vmatpush.bf16.msra.mxu2 %v5422_v5 }
 0x110   :  { %2223 = vmatpush.bf16.msra.mxu0 %v5398_v13  ;;  %2264 = vmatpush.bf16.msra.mxu3 %v5378_v55  ;;  %v6722_v55 = vld [vmem:[#allocation10 + $0xf8] sm:$0xff] }
 0x111   :  { %2236 = vmatpush.bf16.msra.mxu1 %v5402_v18  ;;  %v6778_v18 = vld [vmem:[#allocation10 + $0x1b8] sm:$0xff] }
 0x113   :  { %2249 = vmatpush.bf16.msra.mxu2 %v5406_v19  ;;  %v6761_v19 = vld [vmem:[#allocation10 + $0x130] sm:$0xff] }
 0x114   :  { %v7230_v30 = vpop.f32.mrf.mxu0  ;;  %2224 = vmatpush.bf16.msra.mxu0 %v5382_v2  ;;  %v6767_v2 = vld [vmem:[#allocation10 + $0x160] sm:$0xff] }
 0x115   :  { %v7232_v35 = vpop.f32.mrf.mxu1  ;;  %v1593_v43 = vadd.f32 %v7230_v30, %v1580_v33  ;;  %2237 = vmatpush.bf16.msra.mxu1 %v5386_v27  ;;  %v6775_v27 = vld [vmem:[#allocation10 + $0x1a0] sm:$0xff]  ;;  %v6774_v33 = vld [vmem:[#allocation10 + $0x198] sm:$0xff] }
 0x117   :  { %2250 = vmatpush.bf16.msra.mxu2 %v5390_v34  ;;  %v1606_v30 = vadd.f32 %v7232_v35, %v1593_v43  ;;  %v6782_v34 = vld [vmem:[#allocation10 + $0x1d8] sm:$0xff]  ;;  %v6780_v43 = vld [vmem:[#allocation10 + $0x1c8] sm:$0xff] }
 0x118   :  { %2225 = vmatpush.bf16.msra.mxu0 %v5366_v44  ;;  %v6755_v44 = vld [vmem:[#allocation10 + $0x100] sm:$0xff] }
 0x119   :  { %2238 = vmatpush.bf16.msra.mxu1 %v5370_v50  ;;  %v6697_v50 = vld [vmem:[#allocation10 + $0x30] sm:$0xff] }
 0x11b   :  { %2251 = vmatpush.bf16.msra.mxu2 %v5374_v7  ;;  %v6705_v7 = vld [vmem:[#allocation10 + $0x70] sm:$0xff] }
 0x11c   :  { %v7234_v54 = vpop.f32.mrf.mxu2  ;;  %v1594_v61 = vpop.f32.mrf.mxu0  ;;  %2226 = vmatpush.bf16.msra.mxu0 %v5350_v62  ;;  %v6712_v62 = vld [vmem:[#allocation10 + $0xa8] sm:$0xff] }
 0x11d   :  { %v7238_v57 = vpop.f32.mrf.mxu3  ;;  %v1607_v3 = vpop.f32.mrf.mxu1  ;;  %v5359_v61 = vld [vmem:[#allocation7 + $0x118] sm:$0xf0]  ;;  %v1619_v1 = vadd.f32 %v7234_v54, %v1606_v30  ;;  %2239 = vmatpush.bf16.msra.mxu1 %v5354_v63  ;;  %v6703_v30 = vld [vmem:[#allocation10 + $0x60] sm:$0xff] }
 0x11e   :  { %v5362_v3 = vor.u32 %v6724_v60, %v5359_v61  ;;  %v6721_v60 = vld [vmem:[#allocation10 + $0xf0] sm:$0xff]  ;;  %v6695_v61 = vld [vmem:[#allocation10 + $0x20] sm:$0xff]  ;;  %v6720_v63 = vld [vmem:[#allocation10 + $0xe8] sm:$0xff] }
 0x11f   :  { %2252 = vmatpush.bf16.msra.mxu2 %v5358_v0  ;;  %v1632_v4 = vadd.f32 %v7238_v57, %v1619_v1  ;;  %v6786_v57 = vld [vmem:[#allocation10 + $0x1f8] sm:$0xff] }
 0x120   :  { %2265 = vmatpush.bf16.msra.mxu3 %v5362_v3  ;;  %v6694_v0 = vld [vmem:[#allocation10 + $0x18] sm:$0xff]  ;;  %v6711_v3 = vld [vmem:[#allocation10 + $0xa0] sm:$0xff] }
 0x121   :  { %v6702_v1 = vld [vmem:[#allocation10 + $0x58] sm:$0xff] }
 0x124   :  { %v1620_v17 = vpop.f32.mrf.mxu2 }
 0x125   :  { %v1633_v49 = vpop.f32.mrf.mxu3 }
 0x126   :  { %v6760_v49 = vld [vmem:[#allocation10 + $0x128] sm:$0xff] }
 0x134   :  { %v1644_v5 = vpop.f32.mrf.mxu0 }
 0x135   :  { %v1657_v6 = vpop.f32.mrf.mxu1  ;;  %v1645_v8 = vadd.f32 %v1644_v5, %v1632_v4  ;;  %v6719_v4 = vld [vmem:[#allocation10 + $0xe0] sm:$0xff]  ;;  %v6693_v5 = vld [vmem:[#allocation10 + $0x10] sm:$0xff] }
 0x137   :  { %v1658_v35 = vadd.f32 %v1657_v6, %v1645_v8  ;;  %v6701_v6 = vld [vmem:[#allocation10 + $0x50] sm:$0xff]  ;;  %v6710_v8 = vld [vmem:[#allocation10 + $0x98] sm:$0xff] }
 0x13c   :  { %v1670_v29 = vpop.f32.mrf.mxu2  ;;  %v1646_v10 = vpop.f32.mrf.mxu0 }
 0x13d   :  { %v1683_v45 = vpop.f32.mrf.mxu3  ;;  %v1671_v9 = vadd.f32 %v1670_v29, %v1658_v35  ;;  %v1659_v11 = vpop.f32.mrf.mxu1  ;;  %v6718_v35 = vld [vmem:[#allocation10 + $0xd8] sm:$0xff]  ;;  %v6692_v29 = vld [vmem:[#allocation10 + $0x8] sm:$0xff]  ;;  %v6717_v10 = vld [vmem:[#allocation10 + $0xd0] sm:$0xff] }
 0x13e   :  { %v6691_v11 = vld [vmem:[#allocation10] sm:$0xff] }
 0x13f   :  { %v1684_v12 = vadd.f32 %v1683_v45, %v1671_v9  ;;  %v6700_v45 = vld [vmem:[#allocation10 + $0x48] sm:$0xff]  ;;  %v6709_v9 = vld [vmem:[#allocation10 + $0x90] sm:$0xff] }
 0x141   :  { %v1687_v13 = vmax.f32 %v1684_v12, 0.0  ;;  %v6699_v12 = vld [vmem:[#allocation10 + $0x40] sm:$0xff] }
 0x143   :  { %v7247_v54 = vpack.c.bf16 %v1687_v13, %v1687_v13  ;;  %v6708_v13 = vld [vmem:[#allocation10 + $0x88] sm:$0xff] }
 0x144   :  { %v1672_v16 = vpop.f32.mrf.mxu2 }
 0x145   :  { %v1685_v17 = vpop.f32.mrf.mxu3  ;;  %1899 = vmatmul.bf16.vlgmr.msrb.gmra.mxu0 %v7247_v54  ;;  %1912 = vmatmul.bf16.vlgmr.msrb.gmra.mxu1 %v7247_v54  ;;  %v6715_v16 = vld [vmem:[#allocation10 + $0xc0] sm:$0xff] }
 0x146   :  { %1925 = vmatmul.bf16.vlgmr.msrb.gmra.mxu2 %v7247_v54  ;;  %1938 = vmatmul.bf16.vlgmr.msrb.gmra.mxu3 %v7247_v54 }
 0x147   :  { %2536 = vmatpush.bf16.msrb.mxu0 %v6762_v14  ;;  %2549 = vmatpush.bf16.msrb.mxu1 %v6770_v15  ;;  %v6716_v14 = vld [vmem:[#allocation10 + $0xc8] sm:$0xff]  ;;  %v6707_v15 = vld [vmem:[#allocation10 + $0x80] sm:$0xff] }
 0x148   :  { %2562 = vmatpush.bf16.msrb.mxu2 %v6778_v18  ;;  %2575 = vmatpush.bf16.msrb.mxu3 %v6786_v57 }
 0x14b   :  { %2537 = vmatpush.bf16.msrb.mxu0 %v6761_v19  ;;  %2550 = vmatpush.bf16.msrb.mxu1 %v6769_v20 }
 0x14c   :  { %2563 = vmatpush.bf16.msrb.mxu2 %v6777_v21  ;;  %2576 = vmatpush.bf16.msrb.mxu3 %v6785_v22  ;;  %v2049_v22 = vld [vmem:[#allocation8 + $0x4] sm:$0xf] }
 0x14f   :  { %2538 = vmatpush.bf16.msrb.mxu0 %v6760_v49  ;;  %2551 = vmatpush.bf16.msrb.mxu1 %v6768_v23  ;;  %v2051_v49 = vperm.slane %v2049_v22, 0  ;;  %v2052_v23 = vperm.slane %v2049_v22, 1 }
 0x150   :  { %2564 = vmatpush.bf16.msrb.mxu2 %v6776_v24  ;;  %2577 = vmatpush.bf16.msrb.mxu3 %v6784_v25 }
 0x153   :  { %2539 = vmatpush.bf16.msrb.mxu0 %v6759_v26  ;;  %2552 = vmatpush.bf16.msrb.mxu1 %v6767_v2 }
 0x154   :  { %2565 = vmatpush.bf16.msrb.mxu2 %v6775_v27  ;;  %2578 = vmatpush.bf16.msrb.mxu3 %v6783_v28  ;;  %v5845_v27 = vld [vmem:[#allocation7 + $0x2e0] sm:$0xf] }
 0x155   :  { %2227 = vmatmul.bf16.vlgmr.msra.gmra.mxu0 %v7247_v54  ;;  %2240 = vmatmul.bf16.vlgmr.msra.gmra.mxu1 %v7247_v54 }
 0x156   :  { %2253 = vmatmul.bf16.vlgmr.msra.gmra.mxu2 %v7247_v54  ;;  %2266 = vmatmul.bf16.vlgmr.msra.gmra.mxu3 %v7247_v54 }
 0x157   :  { %2540 = vmatpush.bf16.msrb.mxu0 %v6758_v31  ;;  %2553 = vmatpush.bf16.msrb.mxu1 %v6766_v32  ;;  %v6817_v32 = vld [vmem:[#allocation7 + $0x2ec] sm:$0xf0] }
 0x158   :  { %2566 = vmatpush.bf16.msrb.mxu2 %v6774_v33  ;;  %2579 = vmatpush.bf16.msrb.mxu3 %v6782_v34  ;;  %v6815_v33 = vld [vmem:[#allocation7 + $0x2e4] sm:$0xf]  ;;  %v5847_v34 = vld [vmem:[#allocation7 + $0x2f0] sm:$0xf0] }
 0x15b   :  { %2541 = vmatpush.bf16.msrb.mxu0 %v6757_v36  ;;  %2554 = vmatpush.bf16.msrb.mxu1 %v6765_v37 }
 0x15c   :  { %2567 = vmatpush.bf16.msrb.mxu2 %v6773_v38  ;;  %2580 = vmatpush.bf16.msrb.mxu3 %v6781_v39  ;;  %v2053_v38 = vperm.slane %v2049_v22, 2  ;;  %v2054_v39 = vperm.slane %v2049_v22, 3  ;;  %v6805_v22 = vld [vmem:[#allocation7 + $0x28c] sm:$0xf0] }
 0x15f   :  { %2542 = vmatpush.bf16.msrb.mxu0 %v6756_v40  ;;  %2555 = vmatpush.bf16.msrb.mxu1 %v6764_v41  ;;  %v5846_v40 = vor.u32 %v6817_v32, %v5845_v27  ;;  %v5850_v41 = vor.u32 %v6815_v33, %v5847_v34  ;;  %v6810_v32 = vld [vmem:[#allocation7 + $0x2b4] sm:$0xf0]  ;;  %v6808_v33 = vld [vmem:[#allocation7 + $0x2ac] sm:$0xf]  ;;  %v5823_v34 = vld [vmem:[#allocation7 + $0x2b8] sm:$0xf0] }
 0x160   :  { %2568 = vmatpush.bf16.msrb.mxu2 %v6772_v42  ;;  %2581 = vmatpush.bf16.msrb.mxu3 %v6780_v43  ;;  %v5829_v42 = vld [vmem:[#allocation7 + $0x2c0] sm:$0xf]  ;;  %v6813_v43 = vld [vmem:[#allocation7 + $0x2cc] sm:$0xf0] }
 0x163   :  { %2543 = vmatpush.bf16.msrb.mxu0 %v6755_v44  ;;  %2556 = vmatpush.bf16.msrb.mxu1 %v6763_v46 }
 0x164   :  { %2569 = vmatpush.bf16.msrb.mxu2 %v6771_v51  ;;  %2582 = vmatpush.bf16.msrb.mxu3 %v6779_v52  ;;  %v5830_v52 = vor.u32 %v6813_v43, %v5829_v42  ;;  %v5783_v42 = vld [vmem:[#allocation7 + $0x270] sm:$0xf0] }
 0x167   :  { %2780 = vmatpush.bf16.msra.mxu0 %v6698_v47  ;;  %2793 = vmatpush.bf16.msra.mxu1 %v6706_v48  ;;  %v6811_v47 = vld [vmem:[#allocation7 + $0x2c4] sm:$0xf]  ;;  %v5831_v48 = vld [vmem:[#allocation7 + $0x2d0] sm:$0xf0] }
 0x168   :  { %2806 = vmatpush.bf16.msra.mxu2 %v6714_v53  ;;  %2819 = vmatpush.bf16.msra.mxu3 %v6722_v55  ;;  %v5853_v53 = vld [vmem:[#allocation7 + $0x2e8] sm:$0xf]  ;;  %v6818_v55 = vld [vmem:[#allocation7 + $0x2f4] sm:$0xf0] }
 0x16b   :  { %2781 = vmatpush.bf16.msra.mxu0 %v6697_v50  ;;  %2794 = vmatpush.bf16.msra.mxu1 %v6705_v7  ;;  %v7265_v50 = vld [vmem:[#allocation8] sm:$0xf] }
 0x16c   :  { %2807 = vmatpush.bf16.msra.mxu2 %v6713_v59  ;;  %2820 = vmatpush.bf16.msra.mxu3 %v6721_v60 }
 0x16f   :  { %2782 = vmatpush.bf16.msra.mxu0 %v6696_v56  ;;  %2795 = vmatpush.bf16.msra.mxu1 %v6704_v58  ;;  %v6816_v56 = vld [vmem:[#allocation7 + $0x2ec] sm:$0xf] }
 0x170   :  { %2808 = vmatpush.bf16.msra.mxu2 %v6712_v62  ;;  %2821 = vmatpush.bf16.msra.mxu3 %v6720_v63  ;;  %v5855_v62 = vld [vmem:[#allocation7 + $0x2f8] sm:$0xf0]  ;;  %v5813_v63 = vld [vmem:[#allocation7 + $0x2a0] sm:$0xf] }
 0x173   :  { %2783 = vmatpush.bf16.msra.mxu0 %v6695_v61  ;;  %2796 = vmatpush.bf16.msra.mxu1 %v6703_v30  ;;  %v5834_v30 = vor.u32 %v6811_v47, %v5831_v48  ;;  %v5805_v47 = vld [vmem:[#allocation7 + $0x288] sm:$0xf]  ;;  %v6806_v48 = vld [vmem:[#allocation7 + $0x294] sm:$0xf0] }
 0x174   :  { %2809 = vmatpush.bf16.msra.mxu2 %v6711_v3  ;;  %2822 = vmatpush.bf16.msra.mxu3 %v6719_v4  ;;  %v1724_v3 = vperm.slane %v7265_v50, 1  ;;  %v6807_v4 = vld [vmem:[#allocation7 + $0x2a4] sm:$0xf] }
 0x177   :  { %2784 = vmatpush.bf16.msra.mxu0 %v6694_v0  ;;  %2797 = vmatpush.bf16.msra.mxu1 %v6702_v1  ;;  %v6809_v0 = vld [vmem:[#allocation7 + $0x2ac] sm:$0xf0]  ;;  %v1723_v1 = vperm.slane %v7265_v50, 0 }
 0x178   :  { %2810 = vmatpush.bf16.msra.mxu2 %v6710_v8  ;;  %2823 = vmatpush.bf16.msra.mxu3 %v6718_v35  ;;  %v5854_v35 = vor.u32 %v6818_v55, %v5853_v53  ;;  %v5765_v53 = vld [vmem:[#allocation7 + $0x240] sm:$0xf] }
 0x17b   :  { %2785 = vmatpush.bf16.msra.mxu0 %v6693_v5  ;;  %2798 = vmatpush.bf16.msra.mxu1 %v6701_v6  ;;  %v5815_v5 = vld [vmem:[#allocation7 + $0x2b0] sm:$0xf0] }
 0x17c   :  { %2811 = vmatpush.bf16.msra.mxu2 %v6709_v9  ;;  %2824 = vmatpush.bf16.msra.mxu3 %v6717_v10  ;;  %v5837_v9 = vld [vmem:[#allocation7 + $0x2c8] sm:$0xf]  ;;  %v6814_v10 = vld [vmem:[#allocation7 + $0x2d4] sm:$0xf0] }
 0x17d   :  { %v5838_v27 = vor.u32 %v6814_v10, %v5837_v9  ;;  %v5773_v9 = vld [vmem:[#allocation7 + $0x248] sm:$0xf] }
 0x17f   :  { %2786 = vmatpush.bf16.msra.mxu0 %v6692_v29  ;;  %2799 = vmatpush.bf16.msra.mxu1 %v6700_v45  ;;  %v5858_v29 = vor.u32 %v6816_v56, %v5855_v62  ;;  %v5814_v45 = vor.u32 %v6809_v0, %v5813_v63  ;;  %v5789_v62 = vld [vmem:[#allocation7 + $0x268] sm:$0xf]  ;;  %v6802_v63 = vld [vmem:[#allocation7 + $0x274] sm:$0xf0]  ;;  %v6800_v0 = vld [vmem:[#allocation7 + $0x26c] sm:$0xf] }
 0x180   :  { %2812 = vmatpush.bf16.msra.mxu2 %v6708_v13  ;;  %2825 = vmatpush.bf16.msra.mxu3 %v6716_v14  ;;  %v5818_v13 = vor.u32 %v6807_v4, %v5815_v5  ;;  %v6812_v14 = vld [vmem:[#allocation7 + $0x2cc] sm:$0xf]  ;;  %v5749_v5 = vld [vmem:[#allocation7 + $0x220] sm:$0xf] }
 0x183   :  { %2787 = vmatpush.bf16.msra.mxu0 %v6691_v11  ;;  %2800 = vmatpush.bf16.msra.mxu1 %v6699_v12 }
 0x184   :  { %2813 = vmatpush.bf16.msra.mxu2 %v6707_v15  ;;  %2826 = vmatpush.bf16.msra.mxu3 %v6715_v16  ;;  %v5839_v15 = vld [vmem:[#allocation7 + $0x2d8] sm:$0xf0]  ;;  %v5797_v16 = vld [vmem:[#allocation7 + $0x280] sm:$0xf] }
 0x1c2   :  { %v7257_v17 = vpop.f32.mrf.mxu0  ;;  %v7259_v18 = vpop.f32.mrf.mxu1 }
 0x1c9   :  { %v7261_v57 = vpop.f32.mrf.mxu2  ;;  %v7263_v19 = vpop.f32.mrf.mxu3 }
 0x1ca   :  { %v1902_v20 = vpop.f32.mrf.mxu0  ;;  %v1915_v21 = vpop.f32.mrf.mxu1 }
 0x1cb   :  { %v1901_v20 = vadd.f32 %v7257_v17, %v1723_v1  ;;  %v1914_v21 = vadd.f32 %v7259_v18, %v1724_v3  ;;  %v5798_v17 = vor.u32 %v6805_v22, %v5797_v16  ;;  %v5791_v1 = vld [vmem:[#allocation7 + $0x278] sm:$0xf0]  ;;  %v6787_v22 = vld [vmem:[#allocation7 + $0x204] sm:$0xf] }
 0x1d1   :  { %v1928_v24 = vpop.f32.mrf.mxu2  ;;  %v1941_v25 = vpop.f32.mrf.mxu3 }
 0x1d2   :  { %v2228_v26 = vpop.f32.mrf.mxu0  ;;  %v2241_v2 = vpop.f32.mrf.mxu1  ;;  %v1725_v24 = vperm.slane %v7265_v50, 2  ;;  %v1726_v25 = vperm.slane %v7265_v50, 3  ;;  %v6804_v50 = vld [vmem:[#allocation7 + $0x28c] sm:$0xf] }
 0x1d3   :  { %v2229_v28 = vadd.f32 %v2228_v26, %v2051_v49  ;;  %v2242_v31 = vadd.f32 %v2241_v2, %v2052_v23  ;;  %v6803_v49 = vld [vmem:[#allocation7 + $0x284] sm:$0xf]  ;;  %v5799_v23 = vld [vmem:[#allocation7 + $0x290] sm:$0xf0] }
 0x1d4   :  { %v5802_v18 = vor.u32 %v6803_v49, %v5799_v23  ;;  %v1927_v43 = vadd.f32 %v7261_v57, %v1725_v24  ;;  %v5735_v49 = vld [vmem:[#allocation7 + $0x210] sm:$0xf0] }
 0x1d5   :  { %v2271_v36 = vmax.f32 %v2229_v28, 0.0  ;;  %v2272_v37 = vmax.f32 %v2242_v31, 0.0  ;;  %v5842_v28 = vor.u32 %v6812_v14, %v5839_v15  ;;  %v5821_v31 = vld [vmem:[#allocation7 + $0x2a8] sm:$0xf]  ;;  %v5775_v14 = vld [vmem:[#allocation7 + $0x258] sm:$0xf0] }
 0x1d6   :  { %v1945_v57 = vmax.f32 %v1927_v43, 0.0  ;;  %v6824_v43 = vld [vmem:[#allocation10 + $0x228] sm:$0xff] }
 0x1d7   :  { %v2275_v44 = vpack.c.bf16 %v2271_v36, %v2271_v36  ;;  %v2276_v46 = vpack.c.bf16 %v2272_v37, %v2272_v37  ;;  %v1943_v36 = vmax.f32 %v1901_v20, 0.0  ;;  %v1944_v37 = vmax.f32 %v1914_v21, 0.0  ;;  %v5733_v20 = vld [vmem:[#allocation7 + $0x200] sm:$0xf]  ;;  %v6789_v21 = vld [vmem:[#allocation7 + $0x20c] sm:$0xf0] }
 0x1d8   :  { %v1949_v10 = vpack.c.bf16 %v1945_v57, %v1945_v57  ;;  %v6828_v57 = vld [vmem:[#allocation10 + $0x248] sm:$0xff] }
 0x1d9   :  { %v2254_v7 = vpop.f32.mrf.mxu2  ;;  %v2267_v51 = vpop.f32.mrf.mxu3  ;;  %2544 = vmatmul.bf16.vlgmr.msrb.gmra.mxu0 %v2275_v44  ;;  %2557 = vmatmul.bf16.vlgmr.msrb.gmra.mxu1 %v2276_v46  ;;  %v1940_v44 = vadd.f32 %v7263_v19, %v1726_v25  ;;  %v5826_v46 = vor.u32 %v6808_v33, %v5823_v34  ;;  %v1947_v55 = vpack.c.bf16 %v1943_v36, %v1943_v36  ;;  %v5757_v25 = vld [vmem:[#allocation7 + $0x228] sm:$0xf]  ;;  %v6790_v36 = vld [vmem:[#allocation7 + $0x214] sm:$0xf0] }
 0x1da   :  { %v2255_v58 = vadd.f32 %v2254_v7, %v2053_v38  ;;  %v2268_v59 = vadd.f32 %v2267_v51, %v2054_v39  ;;  %v2230_v60 = vpop.f32.mrf.mxu0  ;;  %v2243_v61 = vpop.f32.mrf.mxu1  ;;  %3036 = vmatpush.bf16.msrb.mxu0 %v5846_v40  ;;  %3049 = vmatpush.bf16.msrb.mxu1 %v5850_v41  ;;  %v5781_v38 = vld [vmem:[#allocation7 + $0x260] sm:$0xf]  ;;  %v5822_v39 = vor.u32 %v6810_v32, %v5821_v31  ;;  %v6801_v40 = vld [vmem:[#allocation7 + $0x26c] sm:$0xf0]  ;;  %v6799_v41 = vld [vmem:[#allocation7 + $0x264] sm:$0xf] }
 0x1db   :  { %v5807_v7 = vld [vmem:[#allocation7 + $0x298] sm:$0xf0]  ;;  %v5782_v51 = vor.u32 %v6801_v40, %v5781_v38  ;;  %v1948_v56 = vpack.c.bf16 %v1944_v37, %v1944_v37  ;;  %v5767_v60 = vld [vmem:[#allocation7 + $0x250] sm:$0xf0]  ;;  %v1946_v61 = vmax.f32 %v1940_v44, 0.0  ;;  %v5806_v19 = vor.u32 %v6806_v48, %v5805_v47  ;;  %v6826_v32 = vld [vmem:[#allocation10 + $0x238] sm:$0xff] }
 0x1dc   :  { %v2273_v6 = vmax.f32 %v2255_v58, 0.0  ;;  %v2274_v8 = vmax.f32 %v2268_v59, 0.0  ;;  %v6797_v58 = vld [vmem:[#allocation7 + $0x24c] sm:$0xf0]  ;;  %v6795_v59 = vld [vmem:[#allocation7 + $0x244] sm:$0xf]  ;;  %v5738_v31 = vor.u32 %v6787_v22, %v5735_v49 }
 0x1dd   :  { %v5766_v3 = vor.u32 %v6797_v58, %v5765_v53  ;;  %v5770_v4 = vor.u32 %v6795_v59, %v5767_v60  ;;  %v5741_v34 = vld [vmem:[#allocation7 + $0x208] sm:$0xf]  ;;  %v6788_v37 = vld [vmem:[#allocation7 + $0x20c] sm:$0xf]  ;;  %v5743_v38 = vld [vmem:[#allocation7 + $0x218] sm:$0xf0] }
 0x1de   :  { %v2277_v11 = vpack.c.bf16 %v2273_v6, %v2273_v6  ;;  %v2278_v12 = vpack.c.bf16 %v2274_v8, %v2274_v8  ;;  %3037 = vmatpush.bf16.msrb.mxu0 %v5830_v52  ;;  %3050 = vmatpush.bf16.msrb.mxu1 %v5834_v30  ;;  %v5786_v52 = vor.u32 %v6799_v41, %v5783_v42  ;;  %v6793_v6 = vld [vmem:[#allocation7 + $0x22c] sm:$0xf0]  ;;  %v6791_v8 = vld [vmem:[#allocation7 + $0x224] sm:$0xf]  ;;  %v6832_v44 = vld [vmem:[#allocation10 + $0x268] sm:$0xff] }
 0x1df   :  { %v5810_v30 = vor.u32 %v6804_v50, %v5807_v7  ;;  %v5750_v15 = vor.u32 %v6793_v6, %v5749_v5  ;;  %v6833_v40 = vld [vmem:[#allocation10 + $0x270] sm:$0xff]  ;;  %v5742_v41 = vor.u32 %v6790_v36, %v5741_v34  ;;  %v5746_v42 = vor.u32 %v6788_v37, %v5743_v38  ;;  %v6850_v47 = vld [vmem:[#allocation10 + $0x2f8] sm:$0xff]  ;;  %v6823_v48 = vld [vmem:[#allocation10 + $0x220] sm:$0xff] }
 0x1e0   :  { %2570 = vmatmul.bf16.vlgmr.msrb.gmra.mxu2 %v2277_v11  ;;  %2583 = vmatmul.bf16.vlgmr.msrb.gmra.mxu3 %v2278_v12  ;;  %v1950_v11 = vpack.c.bf16 %v1946_v61, %v1946_v61  ;;  %v6798_v12 = vld [vmem:[#allocation7 + $0x254] sm:$0xf0]  ;;  %v6822_v7 = vld [vmem:[#allocation10 + $0x218] sm:$0xff]  ;;  %v6849_v53 = vld [vmem:[#allocation10 + $0x2f0] sm:$0xff] }
 0x1e1   :  { %v2256_v26 = vpop.f32.mrf.mxu2  ;;  %v2269_v2 = vpop.f32.mrf.mxu3  ;;  %3062 = vmatpush.bf16.msrb.mxu2 %v5854_v35  ;;  %3075 = vmatpush.bf16.msrb.mxu3 %v5858_v29  ;;  %v5751_v35 = vld [vmem:[#allocation7 + $0x230] sm:$0xf0]  ;;  %v5790_v29 = vor.u32 %v6802_v63, %v5789_v62  ;;  %v5774_v23 = vor.u32 %v6798_v12, %v5773_v9  ;;  %v6840_v58 = vld [vmem:[#allocation10 + $0x2a8] sm:$0xff]  ;;  %v6838_v63 = vld [vmem:[#allocation10 + $0x298] sm:$0xff] }
 0x1e2   :  { %3038 = vmatpush.bf16.msrb.mxu0 %v5814_v45  ;;  %3051 = vmatpush.bf16.msrb.mxu1 %v5818_v13  ;;  %v5794_v45 = vor.u32 %v6800_v0, %v5791_v1  ;;  %v6796_v13 = vld [vmem:[#allocation7 + $0x24c] sm:$0xf]  ;;  %v5754_v16 = vor.u32 %v6791_v8, %v5751_v35  ;;  %v6794_v26 = vld [vmem:[#allocation7 + $0x234] sm:$0xf0]  ;;  %v6848_v59 = vld [vmem:[#allocation10 + $0x2e8] sm:$0xff] }
 0x1e3   :  { %v5778_v24 = vor.u32 %v6796_v13, %v5775_v14  ;;  %v6792_v2 = vld [vmem:[#allocation7 + $0x22c] sm:$0xf]  ;;  %v6831_v50 = vld [vmem:[#allocation10 + $0x260] sm:$0xff]  ;;  %v6820_v60 = vld [vmem:[#allocation10 + $0x208] sm:$0xff] }
 0x1e4   :  { %v6839_v61 = vld [vmem:[#allocation10 + $0x2a0] sm:$0xff]  ;;  %v6846_v0 = vld [vmem:[#allocation10 + $0x2d8] sm:$0xff]  ;;  %v6101_v1 = vld [vmem:[#allocation7 + $0x3e0] sm:$0xf] }
 0x1e5   :  { %3063 = vmatpush.bf16.msrb.mxu2 %v5838_v27  ;;  %3076 = vmatpush.bf16.msrb.mxu3 %v5842_v28  ;;  %v5759_v27 = vld [vmem:[#allocation7 + $0x238] sm:$0xf0]  ;;  %v5734_v28 = vor.u32 %v6789_v21, %v5733_v20  ;;  %v6827_v62 = vld [vmem:[#allocation10 + $0x240] sm:$0xff]  ;;  %v6879_v5 = vld [vmem:[#allocation7 + $0x3e4] sm:$0xf] }
 0x1e6   :  { %3039 = vmatpush.bf16.msrb.mxu0 %v5798_v17  ;;  %3052 = vmatpush.bf16.msrb.mxu1 %v5802_v18  ;;  %v6834_v17 = vld [vmem:[#allocation10 + $0x278] sm:$0xff]  ;;  %v5758_v18 = vor.u32 %v6794_v26, %v5757_v25  ;;  %v5762_v33 = vor.u32 %v6792_v2, %v5759_v27  ;;  %v6103_v6 = vld [vmem:[#allocation7 + $0x3f0] sm:$0xf0]  ;;  %v6837_v35 = vld [vmem:[#allocation10 + $0x290] sm:$0xff] }
 0x1e7   :  { %v6106_v8 = vor.u32 %v6879_v5, %v6103_v6  ;;  %v6877_v9 = vld [vmem:[#allocation7 + $0x3cc] sm:$0xf0]  ;;  %v6087_v12 = vld [vmem:[#allocation7 + $0x3d0] sm:$0xf0]  ;;  %v6836_v14 = vld [vmem:[#allocation10 + $0x288] sm:$0xff] }
 0x1e8   :  { %v6873_v20 = vld [vmem:[#allocation7 + $0x3ac] sm:$0xf0]  ;;  %v6871_v21 = vld [vmem:[#allocation7 + $0x3a4] sm:$0xf]  ;;  %v6835_v2 = vld [vmem:[#allocation10 + $0x280] sm:$0xff] }
 0x1e9   :  { %3064 = vmatpush.bf16.msrb.mxu2 %v5822_v39  ;;  %3077 = vmatpush.bf16.msrb.mxu3 %v5826_v46  ;;  %v6825_v39 = vld [vmem:[#allocation10 + $0x230] sm:$0xff]  ;;  %v6842_v46 = vld [vmem:[#allocation10 + $0x2b8] sm:$0xff]  ;;  %v6843_v27 = vld [vmem:[#allocation10 + $0x2c0] sm:$0xff] }
 0x1ea   :  { %2788 = vmatmul.bf16.vlgmr.msra.gmra.mxu0 %v1947_v55  ;;  %2801 = vmatmul.bf16.vlgmr.msra.gmra.mxu1 %v1948_v56  ;;  %v6821_v55 = vld [vmem:[#allocation10 + $0x210] sm:$0xff]  ;;  %v6882_v36 = vld [vmem:[#allocation7 + $0x3f4] sm:$0xf0]  ;;  %v6880_v37 = vld [vmem:[#allocation7 + $0x3ec] sm:$0xf] }
 0x1eb   :  { %3040 = vmatpush.bf16.msrb.mxu0 %v5782_v51  ;;  %3053 = vmatpush.bf16.msrb.mxu1 %v5786_v52  ;;  %v6830_v51 = vld [vmem:[#allocation10 + $0x258] sm:$0xff]  ;;  %v6841_v52 = vld [vmem:[#allocation10 + $0x2b0] sm:$0xff] }
 0x1ec   :  { %v6829_v56 = vld [vmem:[#allocation10 + $0x250] sm:$0xff] }
 0x1ed   :  { %3065 = vmatpush.bf16.msrb.mxu2 %v5806_v19  ;;  %3078 = vmatpush.bf16.msrb.mxu3 %v5810_v30  ;;  %v6847_v19 = vld [vmem:[#allocation10 + $0x2e0] sm:$0xff]  ;;  %v6109_v34 = vld [vmem:[#allocation7 + $0x3e8] sm:$0xf] }
 0x1ee   :  { %v6819_v30 = vld [vmem:[#allocation10 + $0x200] sm:$0xff]  ;;  %v6110_v38 = vor.u32 %v6882_v36, %v6109_v34 }
 0x1ef   :  { %3041 = vmatpush.bf16.msrb.mxu0 %v5766_v3  ;;  %3054 = vmatpush.bf16.msrb.mxu1 %v5770_v4  ;;  %v6881_v3 = vld [vmem:[#allocation7 + $0x3ec] sm:$0xf0] }
 0x1f0   :  { %2814 = vmatmul.bf16.vlgmr.msra.gmra.mxu2 %v1949_v10  ;;  %2827 = vmatmul.bf16.vlgmr.msra.gmra.mxu3 %v1950_v11  ;;  %v6102_v4 = vor.u32 %v6881_v3, %v6101_v1  ;;  %v6875_v10 = vld [vmem:[#allocation7 + $0x3c4] sm:$0xf]  ;;  %v6079_v1 = vld [vmem:[#allocation7 + $0x3b8] sm:$0xf0] }
 0x1f1   :  { %3066 = vmatpush.bf16.msrb.mxu2 %v5790_v29  ;;  %3079 = vmatpush.bf16.msrb.mxu3 %v5794_v45  ;;  %v6845_v29 = vld [vmem:[#allocation10 + $0x2d0] sm:$0xff]  ;;  %v6085_v45 = vld [vmem:[#allocation7 + $0x3c0] sm:$0xf]  ;;  %v6090_v13 = vor.u32 %v6875_v10, %v6087_v12 }
 0x1f2   :  { %v6086_v11 = vor.u32 %v6877_v9, %v6085_v45  ;;  %v6007_v9 = vld [vmem:[#allocation7 + $0x330] sm:$0xf0]  ;;  %v6061_v10 = vld [vmem:[#allocation7 + $0x388] sm:$0xf] }
 0x1f3   :  { %3042 = vmatpush.bf16.msrb.mxu0 %v5750_v15  ;;  %3055 = vmatpush.bf16.msrb.mxu1 %v5754_v16  ;;  %v6844_v15 = vld [vmem:[#allocation10 + $0x2c8] sm:$0xff] }
 0x1f4   :  { %v6069_v16 = vld [vmem:[#allocation7 + $0x3a0] sm:$0xf] }
 0x1f5   :  { %3067 = vmatpush.bf16.msrb.mxu2 %v5774_v23  ;;  %3080 = vmatpush.bf16.msrb.mxu3 %v5778_v24  ;;  %v6070_v23 = vor.u32 %v6873_v20, %v6069_v16  ;;  %v6071_v24 = vld [vmem:[#allocation7 + $0x3b0] sm:$0xf0]  ;;  %v6063_v16 = vld [vmem:[#allocation7 + $0x398] sm:$0xf0] }
 0x1f6   :  { %v6074_v26 = vor.u32 %v6871_v21, %v6071_v24  ;;  %v6853_v24 = vld [vmem:[#allocation7 + $0x30c] sm:$0xf0] }
 0x1f7   :  { %3043 = vmatpush.bf16.msrb.mxu0 %v5734_v28  ;;  %3056 = vmatpush.bf16.msrb.mxu1 %v5738_v31  ;;  %v6053_v28 = vld [vmem:[#allocation7 + $0x380] sm:$0xf]  ;;  %v6869_v31 = vld [vmem:[#allocation7 + $0x38c] sm:$0xf0] }
 0x1f9   :  { %3068 = vmatpush.bf16.msrb.mxu2 %v5758_v18  ;;  %3081 = vmatpush.bf16.msrb.mxu3 %v5762_v33  ;;  %v6054_v18 = vor.u32 %v6869_v31, %v6053_v28  ;;  %v6866_v28 = vld [vmem:[#allocation7 + $0x374] sm:$0xf0] }
 0x1fa   :  { %3044 = vmatmul.bf16.vlgmr.msrb.gmra.mxu0 %v7247_v54  ;;  %3057 = vmatmul.bf16.vlgmr.msrb.gmra.mxu1 %v7247_v54 }
 0x1fb   :  { %3353 = vmatpush.bf16.msra.mxu0 %v6826_v32  ;;  %3366 = vmatpush.bf16.msra.mxu1 %v6834_v17  ;;  %v6867_v32 = vld [vmem:[#allocation7 + $0x384] sm:$0xf]  ;;  %v6055_v17 = vld [vmem:[#allocation7 + $0x390] sm:$0xf0] }
 0x1fc   :  { %v6058_v33 = vor.u32 %v6867_v32, %v6055_v17 }
 0x1fd   :  { %3069 = vmatpush.bf16.msrb.mxu2 %v5742_v41  ;;  %3082 = vmatpush.bf16.msrb.mxu3 %v5746_v42  ;;  %v6037_v41 = vld [vmem:[#allocation7 + $0x360] sm:$0xf]  ;;  %v6865_v42 = vld [vmem:[#allocation7 + $0x36c] sm:$0xf0] }
 0x1ff   :  { %3354 = vmatpush.bf16.msra.mxu0 %v6825_v39  ;;  %3367 = vmatpush.bf16.msra.mxu1 %v6833_v40  ;;  %v6111_v39 = vld [vmem:[#allocation7 + $0x3f8] sm:$0xf0] }
 0x200   :  { %3070 = vmatmul.bf16.vlgmr.msrb.gmra.mxu2 %v7247_v54  ;;  %3083 = vmatmul.bf16.vlgmr.msrb.gmra.mxu3 %v7247_v54  ;;  %v6114_v40 = vor.u32 %v6880_v37, %v6111_v39  ;;  %v6862_v39 = vld [vmem:[#allocation7 + $0x354] sm:$0xf0] }
 0x201   :  { %3379 = vmatpush.bf16.msra.mxu2 %v6842_v46  ;;  %3392 = vmatpush.bf16.msra.mxu3 %v6850_v47  ;;  %v6039_v46 = vld [vmem:[#allocation7 + $0x370] sm:$0xf0]  ;;  %v6093_v47 = vld [vmem:[#allocation7 + $0x3c8] sm:$0xf] }
 0x203   :  { %3355 = vmatpush.bf16.msra.mxu0 %v6824_v43  ;;  %3368 = vmatpush.bf16.msra.mxu1 %v6832_v44  ;;  %v6863_v43 = vld [vmem:[#allocation7 + $0x364] sm:$0xf]  ;;  %v6038_v44 = vor.u32 %v6865_v42, %v6037_v41  ;;  %v6031_v42 = vld [vmem:[#allocation7 + $0x358] sm:$0xf0] }
 0x205   :  { %3380 = vmatpush.bf16.msra.mxu2 %v6841_v52  ;;  %3393 = vmatpush.bf16.msra.mxu3 %v6849_v53  ;;  %v6876_v53 = vld [vmem:[#allocation7 + $0x3cc] sm:$0xf] }
 0x207   :  { %3356 = vmatpush.bf16.msra.mxu0 %v6823_v48  ;;  %3369 = vmatpush.bf16.msra.mxu1 %v6831_v50  ;;  %v6878_v48 = vld [vmem:[#allocation7 + $0x3d4] sm:$0xf0] }
 0x208   :  { %v6094_v52 = vor.u32 %v6878_v48, %v6093_v47 }
 0x209   :  { %3381 = vmatpush.bf16.msra.mxu2 %v6840_v58  ;;  %3394 = vmatpush.bf16.msra.mxu3 %v6848_v59  ;;  %v6021_v58 = vld [vmem:[#allocation7 + $0x340] sm:$0xf]  ;;  %v6861_v59 = vld [vmem:[#allocation7 + $0x34c] sm:$0xf0] }
 0x20b   :  { %3357 = vmatpush.bf16.msra.mxu0 %v6822_v7  ;;  %3370 = vmatpush.bf16.msra.mxu1 %v6830_v51  ;;  %v6042_v51 = vor.u32 %v6863_v43, %v6039_v46  ;;  %v6858_v46 = vld [vmem:[#allocation7 + $0x334] sm:$0xf0] }
 0x20d   :  { %3382 = vmatpush.bf16.msra.mxu2 %v6839_v61  ;;  %3395 = vmatpush.bf16.msra.mxu3 %v6847_v19  ;;  %v6023_v61 = vld [vmem:[#allocation7 + $0x350] sm:$0xf0]  ;;  %v6077_v19 = vld [vmem:[#allocation7 + $0x3a8] sm:$0xf] }
 0x20f   :  { %3358 = vmatpush.bf16.msra.mxu0 %v6821_v55  ;;  %3371 = vmatpush.bf16.msra.mxu1 %v6829_v56  ;;  %v6095_v55 = vld [vmem:[#allocation7 + $0x3d8] sm:$0xf0] }
 0x210   :  { %v6098_v56 = vor.u32 %v6876_v53, %v6095_v55  ;;  %v5997_v55 = vld [vmem:[#allocation7 + $0x308] sm:$0xf] }
 0x211   :  { %3383 = vmatpush.bf16.msra.mxu2 %v6838_v63  ;;  %3396 = vmatpush.bf16.msra.mxu3 %v6846_v0  ;;  %v6872_v0 = vld [vmem:[#allocation7 + $0x3ac] sm:$0xf] }
 0x212   :  { %v6082_v5 = vor.u32 %v6872_v0, %v6079_v1 }
 0x213   :  { %3359 = vmatpush.bf16.msra.mxu0 %v6820_v60  ;;  %3372 = vmatpush.bf16.msra.mxu1 %v6828_v57  ;;  %v6859_v60 = vld [vmem:[#allocation7 + $0x344] sm:$0xf]  ;;  %v6022_v57 = vor.u32 %v6861_v59, %v6021_v58 }
 0x215   :  { %3384 = vmatpush.bf16.msra.mxu2 %v6837_v35  ;;  %3397 = vmatpush.bf16.msra.mxu3 %v6845_v29  ;;  %v6857_v35 = vld [vmem:[#allocation7 + $0x32c] sm:$0xf0]  ;;  %v6855_v29 = vld [vmem:[#allocation7 + $0x324] sm:$0xf] }
 0x217   :  { %3360 = vmatpush.bf16.msra.mxu0 %v6819_v30  ;;  %3373 = vmatpush.bf16.msra.mxu1 %v6827_v62  ;;  %v6874_v30 = vld [vmem:[#allocation7 + $0x3b4] sm:$0xf0]  ;;  %v6026_v62 = vor.u32 %v6859_v60, %v6023_v61  ;;  %v6852_v60 = vld [vmem:[#allocation7 + $0x30c] sm:$0xf] }
 0x218   :  { %v6078_v63 = vor.u32 %v6874_v30, %v6077_v19 }
 0x219   :  { %3385 = vmatpush.bf16.msra.mxu2 %v6836_v14  ;;  %3398 = vmatpush.bf16.msra.mxu3 %v6844_v15  ;;  %v6868_v15 = vld [vmem:[#allocation7 + $0x38c] sm:$0xf] }
 0x21b   :  { %3610 = vmatpush.bf16.msrb.mxu0 %v6102_v4  ;;  %3623 = vmatpush.bf16.msrb.mxu1 %v6106_v8  ;;  %v6005_v8 = vld [vmem:[#allocation7 + $0x320] sm:$0xf] }
 0x21c   :  { %v6006_v45 = vor.u32 %v6857_v35, %v6005_v8 }
 0x21d   :  { %3386 = vmatpush.bf16.msra.mxu2 %v6835_v2  ;;  %3399 = vmatpush.bf16.msra.mxu3 %v6843_v27  ;;  %v5991_v2 = vld [vmem:[#allocation7 + $0x310] sm:$0xf0]  ;;  %v6045_v27 = vld [vmem:[#allocation7 + $0x368] sm:$0xf] }
 0x21e   :  { %v6046_v17 = vor.u32 %v6866_v28, %v6045_v27  ;;  %v6887_v27 = vld [vmem:[#allocation10 + $0x320] sm:$0xff] }
 0x21f   :  { %3611 = vmatpush.bf16.msrb.mxu0 %v6086_v11  ;;  %3624 = vmatpush.bf16.msrb.mxu1 %v6090_v13  ;;  %v6870_v11 = vld [vmem:[#allocation7 + $0x394] sm:$0xf0]  ;;  %v6010_v13 = vor.u32 %v6855_v29, %v6007_v9  ;;  %v6898_v9 = vld [vmem:[#allocation10 + $0x378] sm:$0xff] }
 0x220   :  { %v6062_v14 = vor.u32 %v6870_v11, %v6061_v10  ;;  %v6895_v28 = vld [vmem:[#allocation10 + $0x360] sm:$0xff] }
 0x221   :  { %3636 = vmatpush.bf16.msrb.mxu2 %v6110_v38  ;;  %3649 = vmatpush.bf16.msrb.mxu3 %v6114_v40  ;;  %v6029_v38 = vld [vmem:[#allocation7 + $0x348] sm:$0xf]  ;;  %v6860_v40 = vld [vmem:[#allocation7 + $0x34c] sm:$0xf] }
 0x222   :  { %v6030_v41 = vor.u32 %v6862_v39, %v6029_v38  ;;  %v6034_v43 = vor.u32 %v6860_v40, %v6031_v42  ;;  %v6885_v38 = vld [vmem:[#allocation10 + $0x310] sm:$0xff]  ;;  %v6884_v42 = vld [vmem:[#allocation10 + $0x308] sm:$0xff] }
 0x223   :  { %3612 = vmatpush.bf16.msrb.mxu0 %v6070_v23  ;;  %3625 = vmatpush.bf16.msrb.mxu1 %v6074_v26  ;;  %v5989_v23 = vld [vmem:[#allocation7 + $0x300] sm:$0xf]  ;;  %v6893_v39 = vld [vmem:[#allocation10 + $0x350] sm:$0xff] }
 0x224   :  { %v5990_v26 = vor.u32 %v6853_v24, %v5989_v23  ;;  %v6896_v23 = vld [vmem:[#allocation10 + $0x368] sm:$0xff]  ;;  %v6905_v40 = vld [vmem:[#allocation10 + $0x3b0] sm:$0xff] }
 0x225   :  { %3637 = vmatpush.bf16.msrb.mxu2 %v6094_v52  ;;  %3650 = vmatpush.bf16.msrb.mxu3 %v6098_v56  ;;  %v6854_v56 = vld [vmem:[#allocation7 + $0x314] sm:$0xf0] }
 0x227   :  { %3613 = vmatpush.bf16.msrb.mxu0 %v6054_v18  ;;  %3626 = vmatpush.bf16.msrb.mxu1 %v6058_v33  ;;  %v6864_v18 = vld [vmem:[#allocation7 + $0x36c] sm:$0xf]  ;;  %v6047_v33 = vld [vmem:[#allocation7 + $0x378] sm:$0xf0] }
 0x228   :  { %v6050_v37 = vor.u32 %v6864_v18, %v6047_v33  ;;  %v6914_v18 = vld [vmem:[#allocation10 + $0x3f8] sm:$0xff] }
 0x229   :  { %3638 = vmatpush.bf16.msrb.mxu2 %v6078_v63  ;;  %3651 = vmatpush.bf16.msrb.mxu3 %v6082_v5 }
 0x22b   :  { %3614 = vmatpush.bf16.msrb.mxu0 %v6038_v44  ;;  %3627 = vmatpush.bf16.msrb.mxu1 %v6042_v51  ;;  %v6013_v44 = vld [vmem:[#allocation7 + $0x328] sm:$0xf] }
 0x22c   :  { %v2866_v51 = vld [vmem:[#allocation8 + $0x8] sm:$0xf]  ;;  %v6014_v52 = vor.u32 %v6858_v46, %v6013_v44  ;;  %v6904_v44 = vld [vmem:[#allocation10 + $0x3a8] sm:$0xff] }
 0x22d   :  { %3639 = vmatpush.bf16.msrb.mxu2 %v6062_v14  ;;  %v2868_v19 = vperm.slane %v2866_v51, 0  ;;  %v2869_v30 = vperm.slane %v2866_v51, 1  ;;  %v6889_v14 = vld [vmem:[#allocation10 + $0x330] sm:$0xff]  ;;  %v6912_v46 = vld [vmem:[#allocation10 + $0x3e8] sm:$0xff] }
 0x22f   :  { %3615 = vmatpush.bf16.msrb.mxu0 %v6022_v57  ;;  %3628 = vmatpush.bf16.msrb.mxu1 %v6026_v62  ;;  %v5999_v57 = vld [vmem:[#allocation7 + $0x318] sm:$0xf0]  ;;  %v5998_v62 = vor.u32 %v6854_v56, %v5997_v55  ;;  %v6903_v56 = vld [vmem:[#allocation10 + $0x3a0] sm:$0xff] }
 0x230   :  { %v6002_v0 = vor.u32 %v6852_v60, %v5999_v57  ;;  %v6941_v60 = vld [vmem:[#allocation7 + $0x4cc] sm:$0xf0]  ;;  %v6939_v57 = vld [vmem:[#allocation7 + $0x4c4] sm:$0xf] }
 0x231   :  { %3640 = vmatpush.bf16.msrb.mxu2 %v6046_v17  ;;  %v6906_v17 = vld [vmem:[#allocation10 + $0x3b8] sm:$0xff] }
 0x233   :  { %3616 = vmatpush.bf16.msrb.mxu0 %v6006_v45  ;;  %3629 = vmatpush.bf16.msrb.mxu1 %v6010_v13  ;;  %v6890_v45 = vld [vmem:[#allocation10 + $0x338] sm:$0xff] }
 0x235   :  { %3641 = vmatpush.bf16.msrb.mxu2 %v6030_v41  ;;  %v6913_v41 = vld [vmem:[#allocation10 + $0x3f0] sm:$0xff] }
 0x237   :  { %3617 = vmatpush.bf16.msrb.mxu0 %v5990_v26 }
 0x239   :  { %3642 = vmatpush.bf16.msrb.mxu2 %v6014_v52 }
 0x23d   :  { %3643 = vmatpush.bf16.msrb.mxu2 %v5998_v62 }
 0x256   :  { %v2545_v22 = vpop.f32.mrf.mxu0  ;;  %v2558_v49 = vpop.f32.mrf.mxu1 }
 0x257   :  { %v2559_v25 = vadd.f32 %v2558_v49, %v2545_v22  ;;  %v6066_v22 = vor.u32 %v6868_v15, %v6063_v16  ;;  %v6897_v15 = vld [vmem:[#allocation10 + $0x370] sm:$0xff]  ;;  %v2870_v16 = vperm.slane %v2866_v51, 2 }
 0x259   :  { %3652 = vmatpush.bf16.msrb.mxu3 %v6066_v22 }
 0x25d   :  { %3653 = vmatpush.bf16.msrb.mxu3 %v6050_v37  ;;  %v6894_v37 = vld [vmem:[#allocation10 + $0x358] sm:$0xff] }
 0x25e   :  { %v2547_v50 = vpop.f32.mrf.mxu0  ;;  %v2560_v7 = vpop.f32.mrf.mxu1 }
 0x25f   :  { %v6856_v50 = vld [vmem:[#allocation7 + $0x32c] sm:$0xf]  ;;  %v6015_v7 = vld [vmem:[#allocation7 + $0x338] sm:$0xf0] }
 0x260   :  { %v6018_v53 = vor.u32 %v6856_v50, %v6015_v7  ;;  %v6357_v50 = vld [vmem:[#allocation7 + $0x4e0] sm:$0xf]  ;;  %v6945_v7 = vld [vmem:[#allocation7 + $0x4ec] sm:$0xf0] }
 0x261   :  { %3654 = vmatpush.bf16.msrb.mxu3 %v6034_v43  ;;  %v6892_v43 = vld [vmem:[#allocation10 + $0x348] sm:$0xff]  ;;  %v6358_v52 = vor.u32 %v6945_v7, %v6357_v50 }
 0x263   :  { %v2571_v3 = vpop.f32.mrf.mxu2  ;;  %v2584_v4 = vpop.f32.mrf.mxu3 }
 0x264   :  { %v2572_v6 = vadd.f32 %v2571_v3, %v2559_v25  ;;  %v6851_v25 = vld [vmem:[#allocation7 + $0x304] sm:$0xf] }
 0x265   :  { %v5994_v32 = vor.u32 %v6851_v25, %v5991_v2  ;;  %3655 = vmatpush.bf16.msrb.mxu3 %v6018_v53  ;;  %v6359_v53 = vld [vmem:[#allocation7 + $0x4f0] sm:$0xf0] }
 0x266   :  { %v2585_v12 = vadd.f32 %v2584_v4, %v2572_v6 }
 0x267   :  { %v2789_v20 = vpop.f32.mrf.mxu0  ;;  %v2802_v21 = vpop.f32.mrf.mxu1  ;;  %3630 = vmatpush.bf16.msrb.mxu1 %v5994_v32 }
 0x268   :  { %v2790_v49 = vadd.f32 %v2789_v20, %v2585_v12  ;;  %v2871_v20 = vperm.slane %v2866_v51, 3  ;;  %v6943_v51 = vld [vmem:[#allocation7 + $0x4e4] sm:$0xf] }
 0x269   :  { %3656 = vmatpush.bf16.msrb.mxu3 %v6002_v0  ;;  %v6362_v55 = vor.u32 %v6943_v51, %v6359_v53  ;;  %v6910_v0 = vld [vmem:[#allocation10 + $0x3d8] sm:$0xff]  ;;  %v6333_v51 = vld [vmem:[#allocation7 + $0x4a8] sm:$0xf] }
 0x26a   :  { %v2803_v31 = vadd.f32 %v2802_v21, %v2790_v49  ;;  %v6888_v49 = vld [vmem:[#allocation10 + $0x328] sm:$0xff]  ;;  %v6936_v53 = vld [vmem:[#allocation7 + $0x4ac] sm:$0xf] }
 0x26b   :  { %v2573_v34 = vpop.f32.mrf.mxu2  ;;  %v2586_v36 = vpop.f32.mrf.mxu3 }
 0x26c   :  { %v6886_v36 = vld [vmem:[#allocation10 + $0x318] sm:$0xff] }
 0x26f   :  { %v2791_v47 = vpop.f32.mrf.mxu0  ;;  %v2804_v48 = vpop.f32.mrf.mxu1 }
 0x270   :  { %v6883_v47 = vld [vmem:[#allocation10 + $0x300] sm:$0xff] }
 0x271   :  { %v6891_v48 = vld [vmem:[#allocation10 + $0x340] sm:$0xff] }
 0x273   :  { %v2815_v58 = vpop.f32.mrf.mxu2  ;;  %v2828_v59 = vpop.f32.mrf.mxu3 }
 0x274   :  { %v2816_v61 = vadd.f32 %v2815_v58, %v2803_v31  ;;  %v6911_v58 = vld [vmem:[#allocation10 + $0x3e0] sm:$0xff] }
 0x276   :  { %v7279_v63 = vadd.f32 %v2828_v59, %v2816_v61  ;;  %v6341_v59 = vld [vmem:[#allocation7 + $0x4c0] sm:$0xf] }
 0x277   :  { %v3045_v1 = vpop.f32.mrf.mxu0  ;;  %v3058_v3 = vpop.f32.mrf.mxu1  ;;  %v6342_v61 = vor.u32 %v6941_v60, %v6341_v59  ;;  %v6335_v59 = vld [vmem:[#allocation7 + $0x4b8] sm:$0xf0] }
 0x278   :  { %v3046_v4 = vadd.f32 %v3045_v1, %v2868_v19  ;;  %v3059_v5 = vadd.f32 %v3058_v3, %v2869_v30  ;;  %v6343_v19 = vld [vmem:[#allocation7 + $0x4d0] sm:$0xf0]  ;;  %v6902_v30 = vld [vmem:[#allocation10 + $0x398] sm:$0xff]  ;;  %v6325_v1 = vld [vmem:[#allocation7 + $0x4a0] sm:$0xf] }
 0x279   :  { %v6346_v62 = vor.u32 %v6939_v57, %v6343_v19  ;;  %v6937_v3 = vld [vmem:[#allocation7 + $0x4ac] sm:$0xf0]  ;;  %v6338_v57 = vor.u32 %v6936_v53, %v6335_v59 }
 0x27a   :  { %v3088_v6 = vmax.f32 %v3046_v4, 0.0  ;;  %v3089_v8 = vmax.f32 %v3059_v5, 0.0  ;;  %v6935_v4 = vld [vmem:[#allocation7 + $0x4a4] sm:$0xf]  ;;  %v6326_v5 = vor.u32 %v6937_v3, %v6325_v1  ;;  %v6917_v19 = vld [vmem:[#allocation7 + $0x40c] sm:$0xf0] }
 0x27b   :  { %v2817_v35 = vpop.f32.mrf.mxu2  ;;  %v2830_v29 = vpop.f32.mrf.mxu3  ;;  %v6317_v3 = vld [vmem:[#allocation7 + $0x488] sm:$0xf] }
 0x27c   :  { %v3092_v10 = vpack.c.bf16 %v3088_v6, %v3088_v6  ;;  %v3093_v11 = vpack.c.bf16 %v3089_v8, %v3089_v8  ;;  %v6327_v6 = vld [vmem:[#allocation7 + $0x4b0] sm:$0xf0]  ;;  %v6901_v35 = vld [vmem:[#allocation10 + $0x390] sm:$0xff] }
 0x27d   :  { %v6330_v8 = vor.u32 %v6935_v4, %v6327_v6  ;;  %v6909_v29 = vld [vmem:[#allocation10 + $0x3d0] sm:$0xff]  ;;  %v6934_v4 = vld [vmem:[#allocation7 + $0x494] sm:$0xf0] }
 0x27e   :  { %3361 = vmatmul.bf16.vlgmr.msra.gmra.mxu0 %v3092_v10  ;;  %3374 = vmatmul.bf16.vlgmr.msra.gmra.mxu1 %v3093_v11  ;;  %v6931_v10 = vld [vmem:[#allocation7 + $0x484] sm:$0xf]  ;;  %v6318_v6 = vor.u32 %v6934_v4, %v6317_v3 }
 0x27f   :  { %v3047_v12 = vpop.f32.mrf.mxu0  ;;  %v3060_v13 = vpop.f32.mrf.mxu1  ;;  %3927 = vmatpush.bf16.msra.mxu0 %v6890_v45  ;;  %3940 = vmatpush.bf16.msra.mxu1 %v6898_v9  ;;  %v6309_v45 = vld [vmem:[#allocation7 + $0x480] sm:$0xf]  ;;  %v6933_v9 = vld [vmem:[#allocation7 + $0x48c] sm:$0xf0] }
 0x280   :  { %v6310_v11 = vor.u32 %v6933_v9, %v6309_v45  ;;  %v6311_v12 = vld [vmem:[#allocation7 + $0x490] sm:$0xf0]  ;;  %v6930_v45 = vld [vmem:[#allocation7 + $0x474] sm:$0xf0]  ;;  %v6928_v9 = vld [vmem:[#allocation7 + $0x46c] sm:$0xf] }
 0x281   :  { %v6314_v13 = vor.u32 %v6931_v10, %v6311_v12 }
 0x283   :  { %v3071_v21 = vpop.f32.mrf.mxu2  ;;  %v3084_v22 = vpop.f32.mrf.mxu3  ;;  %3928 = vmatpush.bf16.msra.mxu0 %v6889_v14  ;;  %3941 = vmatpush.bf16.msra.mxu1 %v6897_v15  ;;  %v6900_v14 = vld [vmem:[#allocation10 + $0x388] sm:$0xff] }
 0x284   :  { %v3072_v24 = vadd.f32 %v3071_v21, %v2870_v16  ;;  %v3085_v25 = vadd.f32 %v3084_v22, %v2871_v20  ;;  %v6908_v15 = vld [vmem:[#allocation10 + $0x3c8] sm:$0xff]  ;;  %v6929_v20 = vld [vmem:[#allocation7 + $0x46c] sm:$0xf0]  ;;  %v6927_v21 = vld [vmem:[#allocation7 + $0x464] sm:$0xf] }
 0x285   :  { %v6293_v16 = vld [vmem:[#allocation7 + $0x460] sm:$0xf] }
 0x286   :  { %v3090_v26 = vmax.f32 %v3072_v24, 0.0  ;;  %v3091_v2 = vmax.f32 %v3085_v25, 0.0  ;;  %v6294_v22 = vor.u32 %v6929_v20, %v6293_v16  ;;  %v6899_v24 = vld [vmem:[#allocation10 + $0x380] sm:$0xff]  ;;  %v6285_v16 = vld [vmem:[#allocation7 + $0x448] sm:$0xf] }
 0x287   :  { %3929 = vmatpush.bf16.msra.mxu0 %v6888_v49  ;;  %3942 = vmatpush.bf16.msra.mxu1 %v6896_v23  ;;  %v6295_v49 = vld [vmem:[#allocation7 + $0x470] sm:$0xf0]  ;;  %v6926_v20 = vld [vmem:[#allocation7 + $0x454] sm:$0xf0] }
 0x288   :  { %v3094_v31 = vpack.c.bf16 %v3090_v26, %v3090_v26  ;;  %v3095_v32 = vpack.c.bf16 %v3091_v2, %v3091_v2  ;;  %v6298_v23 = vor.u32 %v6927_v21, %v6295_v49  ;;  %v6907_v25 = vld [vmem:[#allocation10 + $0x3c0] sm:$0xff]  ;;  %v6365_v26 = vld [vmem:[#allocation7 + $0x4e8] sm:$0xf]  ;;  %v6924_v21 = vld [vmem:[#allocation7 + $0x44c] sm:$0xf] }
 0x289   :  { %v6946_v2 = vld [vmem:[#allocation7 + $0x4f4] sm:$0xf0]  ;;  %v6287_v49 = vld [vmem:[#allocation7 + $0x458] sm:$0xf0] }
 0x28a   :  { %3387 = vmatmul.bf16.vlgmr.msra.gmra.mxu2 %v3094_v31  ;;  %3400 = vmatmul.bf16.vlgmr.msra.gmra.mxu3 %v3095_v32  ;;  %v6366_v31 = vor.u32 %v6946_v2, %v6365_v26  ;;  %v6920_v26 = vld [vmem:[#allocation7 + $0x42c] sm:$0xf]  ;;  %v6271_v2 = vld [vmem:[#allocation7 + $0x438] sm:$0xf0] }
 0x28b   :  { %v3073_v33 = vpop.f32.mrf.mxu2  ;;  %v3086_v34 = vpop.f32.mrf.mxu3  ;;  %3930 = vmatpush.bf16.msra.mxu0 %v6887_v27  ;;  %3943 = vmatpush.bf16.msra.mxu1 %v6895_v28  ;;  %v6944_v27 = vld [vmem:[#allocation7 + $0x4ec] sm:$0xf]  ;;  %v6367_v28 = vld [vmem:[#allocation7 + $0x4f8] sm:$0xf0] }
 0x28c   :  { %3953 = vmatpush.bf16.msra.mxu2 %v6906_v17  ;;  %3966 = vmatpush.bf16.msra.mxu3 %v6914_v18  ;;  %v6370_v32 = vor.u32 %v6944_v27, %v6367_v28  ;;  %v6277_v17 = vld [vmem:[#allocation7 + $0x440] sm:$0xf]  ;;  %v6925_v18 = vld [vmem:[#allocation7 + $0x44c] sm:$0xf0]  ;;  %v6923_v33 = vld [vmem:[#allocation7 + $0x444] sm:$0xf] }
 0x28d   :  { %v6278_v34 = vor.u32 %v6925_v18, %v6277_v17 }
 0x28e   :  { %3618 = vmatmul.bf16.vlgmr.msrb.gmra.mxu0 %v7247_v54  ;;  %3631 = vmatmul.bf16.vlgmr.msrb.gmra.mxu1 %v7247_v54 }
 0x28f   :  { %3931 = vmatpush.bf16.msra.mxu0 %v6886_v36  ;;  %3944 = vmatpush.bf16.msra.mxu1 %v6894_v37  ;;  %v6279_v36 = vld [vmem:[#allocation7 + $0x450] sm:$0xf0]  ;;  %v6349_v37 = vld [vmem:[#allocation7 + $0x4c8] sm:$0xf] }
 0x290   :  { %3954 = vmatpush.bf16.msra.mxu2 %v6905_v40  ;;  %3967 = vmatpush.bf16.msra.mxu3 %v6913_v41  ;;  %v6940_v41 = vld [vmem:[#allocation7 + $0x4cc] sm:$0xf] }
 0x293   :  { %3932 = vmatpush.bf16.msra.mxu0 %v6885_v38  ;;  %3945 = vmatpush.bf16.msra.mxu1 %v6893_v39  ;;  %v6942_v38 = vld [vmem:[#allocation7 + $0x4d4] sm:$0xf0]  ;;  %v6282_v39 = vor.u32 %v6923_v33, %v6279_v36  ;;  %v6253_v33 = vld [vmem:[#allocation7 + $0x408] sm:$0xf] }
 0x294   :  { %3955 = vmatpush.bf16.msra.mxu2 %v6904_v44  ;;  %3968 = vmatpush.bf16.msra.mxu3 %v6912_v46  ;;  %v6350_v40 = vor.u32 %v6942_v38, %v6349_v37  ;;  %v6921_v46 = vld [vmem:[#allocation7 + $0x42c] sm:$0xf0]  ;;  %v6918_v37 = vld [vmem:[#allocation7 + $0x414] sm:$0xf0]  ;;  %v6916_v38 = vld [vmem:[#allocation7 + $0x40c] sm:$0xf] }
 0x297   :  { %3933 = vmatpush.bf16.msra.mxu0 %v6884_v42  ;;  %3946 = vmatpush.bf16.msra.mxu1 %v6892_v43  ;;  %v6351_v42 = vld [vmem:[#allocation7 + $0x4d8] sm:$0xf0]  ;;  %v6261_v43 = vld [vmem:[#allocation7 + $0x420] sm:$0xf] }
 0x298   :  { %3956 = vmatpush.bf16.msra.mxu2 %v6903_v56  ;;  %3969 = vmatpush.bf16.msra.mxu3 %v6911_v58  ;;  %v6354_v44 = vor.u32 %v6940_v41, %v6351_v42  ;;  %v6262_v50 = vor.u32 %v6921_v46, %v6261_v43  ;;  %v6254_v46 = vor.u32 %v6918_v37, %v6253_v33  ;;  %v6964_v33 = vld [vmem:[#allocation10 + $0x488] sm:$0xff] }
 0x29a   :  { %3644 = vmatmul.bf16.vlgmr.msrb.gmra.mxu2 %v7247_v54  ;;  %3657 = vmatmul.bf16.vlgmr.msrb.gmra.mxu3 %v7247_v54 }
 0x29b   :  { %3934 = vmatpush.bf16.msra.mxu0 %v6883_v47  ;;  %3947 = vmatpush.bf16.msra.mxu1 %v6891_v48  ;;  %v6919_v47 = vld [vmem:[#allocation7 + $0x424] sm:$0xf]  ;;  %v6263_v48 = vld [vmem:[#allocation7 + $0x430] sm:$0xf0] }
 0x29c   :  { %3957 = vmatpush.bf16.msra.mxu2 %v6902_v30  ;;  %3970 = vmatpush.bf16.msra.mxu3 %v6910_v0  ;;  %v6266_v7 = vor.u32 %v6919_v47, %v6263_v48  ;;  %v6247_v0 = vld [vmem:[#allocation7 + $0x410] sm:$0xf0] }
 0x29f   :  { %4184 = vmatpush.bf16.msrb.mxu0 %v6358_v52  ;;  %4197 = vmatpush.bf16.msrb.mxu1 %v6362_v55  ;;  %v6938_v52 = vld [vmem:[#allocation7 + $0x4b4] sm:$0xf0] }
 0x2a0   :  { %3958 = vmatpush.bf16.msra.mxu2 %v6901_v35  ;;  %3971 = vmatpush.bf16.msra.mxu3 %v6909_v29  ;;  %v6334_v58 = vor.u32 %v6938_v52, %v6333_v51  ;;  %v6301_v29 = vld [vmem:[#allocation7 + $0x468] sm:$0xf] }
 0x2a1   :  { %v6302_v12 = vor.u32 %v6930_v45, %v6301_v29  ;;  %v6960_v29 = vld [vmem:[#allocation10 + $0x468] sm:$0xff]  ;;  %v6951_v45 = vld [vmem:[#allocation10 + $0x420] sm:$0xff] }
 0x2a3   :  { %4185 = vmatpush.bf16.msrb.mxu0 %v6342_v61  ;;  %4198 = vmatpush.bf16.msrb.mxu1 %v6346_v62  ;;  %v6245_v61 = vld [vmem:[#allocation7 + $0x400] sm:$0xf]  ;;  %v6915_v62 = vld [vmem:[#allocation7 + $0x404] sm:$0xf] }
 0x2a4   :  { %3959 = vmatpush.bf16.msra.mxu2 %v6900_v14  ;;  %3972 = vmatpush.bf16.msra.mxu3 %v6908_v15  ;;  %v6246_v30 = vor.u32 %v6917_v19, %v6245_v61  ;;  %v6250_v1 = vor.u32 %v6915_v62, %v6247_v0  ;;  %v7285_v14 = vld [vmem:[#allocation8 + $0xc] sm:$0xf] }
 0x2a5   :  { %v3442_v27 = vperm.slane %v7285_v14, 0  ;;  %v3443_v28 = vperm.slane %v7285_v14, 1  ;;  %v3444_v61 = vperm.slane %v7285_v14, 2  ;;  %v3445_v19 = vperm.slane %v7285_v14, 3  ;;  %v6948_v14 = vld [vmem:[#allocation10 + $0x408] sm:$0xff] }
 0x2a7   :  { %4186 = vmatpush.bf16.msrb.mxu0 %v6326_v5  ;;  %4199 = vmatpush.bf16.msrb.mxu1 %v6330_v8  ;;  %v6932_v5 = vld [vmem:[#allocation7 + $0x48c] sm:$0xf]  ;;  %v6319_v8 = vld [vmem:[#allocation7 + $0x498] sm:$0xf0] }
 0x2a8   :  { %3960 = vmatpush.bf16.msra.mxu2 %v6899_v24  ;;  %3973 = vmatpush.bf16.msra.mxu3 %v6907_v25  ;;  %v6322_v35 = vor.u32 %v6932_v5, %v6319_v8  ;;  %v6290_v24 = vor.u32 %v6924_v21, %v6287_v49  ;;  %v6922_v25 = vld [vmem:[#allocation7 + $0x434] sm:$0xf0]  ;;  %v6977_v49 = vld [vmem:[#allocation10 + $0x4f0] sm:$0xff] }
 0x2a9   :  { %v6955_v21 = vld [vmem:[#allocation10 + $0x440] sm:$0xff] }
 0x2ab   :  { %4187 = vmatpush.bf16.msrb.mxu0 %v6310_v11  ;;  %4200 = vmatpush.bf16.msrb.mxu1 %v6314_v13  ;;  %v6303_v13 = vld [vmem:[#allocation7 + $0x478] sm:$0xf0] }
 0x2ac   :  { %4210 = vmatpush.bf16.msrb.mxu2 %v6366_v31  ;;  %4223 = vmatpush.bf16.msrb.mxu3 %v6370_v32  ;;  %v6306_v15 = vor.u32 %v6928_v9, %v6303_v13  ;;  %v6274_v32 = vor.u32 %v6920_v26, %v6271_v2  ;;  %v6959_v9 = vld [vmem:[#allocation10 + $0x460] sm:$0xff]  ;;  %v6957_v13 = vld [vmem:[#allocation10 + $0x450] sm:$0xff]  ;;  %v6966_v2 = vld [vmem:[#allocation10 + $0x498] sm:$0xff] }
 0x2ad   :  { %v6975_v26 = vld [vmem:[#allocation10 + $0x4e0] sm:$0xff] }
 0x2af   :  { %4188 = vmatpush.bf16.msrb.mxu0 %v6294_v22  ;;  %4201 = vmatpush.bf16.msrb.mxu1 %v6298_v23  ;;  %v6286_v22 = vor.u32 %v6926_v20, %v6285_v16  ;;  %v6269_v23 = vld [vmem:[#allocation7 + $0x428] sm:$0xf]  ;;  %v6970_v16 = vld [vmem:[#allocation10 + $0x4b8] sm:$0xff]  ;;  %v6947_v20 = vld [vmem:[#allocation10 + $0x400] sm:$0xff] }
 0x2b0   :  { %4211 = vmatpush.bf16.msrb.mxu2 %v6350_v40  ;;  %4224 = vmatpush.bf16.msrb.mxu3 %v6354_v44  ;;  %v6270_v31 = vor.u32 %v6922_v25, %v6269_v23  ;;  %v6968_v23 = vld [vmem:[#allocation10 + $0x4a8] sm:$0xff]  ;;  %v6967_v25 = vld [vmem:[#allocation10 + $0x4a0] sm:$0xff] }
 0x2b3   :  { %4189 = vmatpush.bf16.msrb.mxu0 %v6278_v34  ;;  %4202 = vmatpush.bf16.msrb.mxu1 %v6282_v39  ;;  %v6255_v39 = vld [vmem:[#allocation7 + $0x418] sm:$0xf0] }
 0x2b4   :  { %4212 = vmatpush.bf16.msrb.mxu2 %v6334_v58  ;;  %4225 = vmatpush.bf16.msrb.mxu3 %v6338_v57  ;;  %v6258_v47 = vor.u32 %v6916_v38, %v6255_v39  ;;  %v6961_v57 = vld [vmem:[#allocation10 + $0x470] sm:$0xff]  ;;  %v4014_v38 = vld [vmem:[#allocation8 + $0x10] sm:$0xf]  ;;  %v6963_v39 = vld [vmem:[#allocation10 + $0x480] sm:$0xff] }
 0x2b7   :  { %4190 = vmatpush.bf16.msrb.mxu0 %v6262_v50  ;;  %4203 = vmatpush.bf16.msrb.mxu1 %v6266_v7 }
 0x2b8   :  { %4213 = vmatpush.bf16.msrb.mxu2 %v6318_v6  ;;  %4226 = vmatpush.bf16.msrb.mxu3 %v6322_v35  ;;  %v6952_v35 = vld [vmem:[#allocation10 + $0x428] sm:$0xff] }
 0x2bb   :  { %4191 = vmatpush.bf16.msrb.mxu0 %v6246_v30  ;;  %4204 = vmatpush.bf16.msrb.mxu1 %v6250_v1 }
 0x2bc   :  { %4214 = vmatpush.bf16.msrb.mxu2 %v6302_v12  ;;  %4227 = vmatpush.bf16.msrb.mxu3 %v6306_v15  ;;  %v6949_v12 = vld [vmem:[#allocation10 + $0x410] sm:$0xff]  ;;  %v6956_v15 = vld [vmem:[#allocation10 + $0x448] sm:$0xff] }
 0x2c0   :  { %4215 = vmatpush.bf16.msrb.mxu2 %v6286_v22  ;;  %4228 = vmatpush.bf16.msrb.mxu3 %v6290_v24  ;;  %v6969_v22 = vld [vmem:[#allocation10 + $0x4b0] sm:$0xff]  ;;  %v6976_v24 = vld [vmem:[#allocation10 + $0x4e8] sm:$0xff] }
 0x2c4   :  { %4216 = vmatpush.bf16.msrb.mxu2 %v6270_v31  ;;  %4229 = vmatpush.bf16.msrb.mxu3 %v6274_v32 }
 0x2c8   :  { %4217 = vmatpush.bf16.msrb.mxu2 %v6254_v46  ;;  %4230 = vmatpush.bf16.msrb.mxu3 %v6258_v47 }
 0x2fb   :  { %v3362_v55 = vpop.f32.mrf.mxu0  ;;  %v3375_v56 = vpop.f32.mrf.mxu1 }
 0x2fc   :  { %v3376_v60 = vadd.f32 %v3375_v56, %v3362_v55  ;;  %v6954_v55 = vld [vmem:[#allocation10 + $0x438] sm:$0xff] }
 0x2fd   :  { %v6962_v56 = vld [vmem:[#allocation10 + $0x478] sm:$0xff] }
 0x303   :  { %v3364_v10 = vpop.f32.mrf.mxu0  ;;  %v3377_v11 = vpop.f32.mrf.mxu1 }
 0x304   :  { %v6950_v10 = vld [vmem:[#allocation10 + $0x418] sm:$0xff] }
 0x305   :  { %v6958_v11 = vld [vmem:[#allocation10 + $0x458] sm:$0xff] }
 0x30b   :  { %v3619_v17 = vpop.f32.mrf.mxu0  ;;  %v3632_v18 = vpop.f32.mrf.mxu1 }
 0x30c   :  { %v3620_v34 = vadd.f32 %v3619_v17, %v3442_v27  ;;  %v3633_v36 = vadd.f32 %v3632_v18, %v3443_v28  ;;  %v6974_v27 = vld [vmem:[#allocation10 + $0x4d8] sm:$0xff]  ;;  %v6965_v17 = vld [vmem:[#allocation10 + $0x490] sm:$0xff] }
 0x30d   :  { %v3388_v40 = vpop.f32.mrf.mxu2  ;;  %v3401_v41 = vpop.f32.mrf.mxu3  ;;  %v6973_v18 = vld [vmem:[#allocation10 + $0x4d0] sm:$0xff] }
 0x30e   :  { %v3662_v42 = vmax.f32 %v3620_v34, 0.0  ;;  %v3663_v43 = vmax.f32 %v3633_v36, 0.0  ;;  %v3389_v44 = vadd.f32 %v3388_v40, %v3376_v60  ;;  %v6953_v60 = vld [vmem:[#allocation10 + $0x430] sm:$0xff]  ;;  %v6972_v34 = vld [vmem:[#allocation10 + $0x4c8] sm:$0xff]  ;;  %v6971_v40 = vld [vmem:[#allocation10 + $0x4c0] sm:$0xff] }
 0x310   :  { %v3666_v48 = vpack.c.bf16 %v3662_v42, %v3662_v42  ;;  %v3667_v50 = vpack.c.bf16 %v3663_v43, %v3663_v43  ;;  %v3402_v7 = vadd.f32 %v3401_v41, %v3389_v44  ;;  %v4016_v41 = vperm.slane %v4014_v38, 0 }
 0x311   :  { %v4017_v42 = vperm.slane %v4014_v38, 1 }
 0x312   :  { %v7290_v51 = vadd.f32 %v3402_v7, %v7279_v63  ;;  %3935 = vmatmul.bf16.vlgmr.msra.gmra.mxu0 %v3666_v48  ;;  %3948 = vmatmul.bf16.vlgmr.msra.gmra.mxu1 %v3667_v50 }
 0x313   :  { %v3621_v52 = vpop.f32.mrf.mxu0  ;;  %v3634_v53 = vpop.f32.mrf.mxu1  ;;  %4501 = vmatpush.bf16.msra.mxu0 %v6954_v55  ;;  %4514 = vmatpush.bf16.msra.mxu1 %v6962_v56 }
 0x315   :  { %v3390_v58 = vpop.f32.mrf.mxu2  ;;  %v3403_v59 = vpop.f32.mrf.mxu3 }
 0x317   :  { %4502 = vmatpush.bf16.msra.mxu0 %v6953_v60  ;;  %4515 = vmatpush.bf16.msra.mxu1 %v6961_v57 }
 0x31b   :  { %4503 = vmatpush.bf16.msra.mxu0 %v6952_v35  ;;  %4516 = vmatpush.bf16.msra.mxu1 %v6960_v29 }
 0x31d   :  { %v3645_v63 = vpop.f32.mrf.mxu2  ;;  %v3658_v30 = vpop.f32.mrf.mxu3 }
 0x31e   :  { %v3646_v62 = vadd.f32 %v3645_v63, %v3444_v61  ;;  %v3659_v0 = vadd.f32 %v3658_v30, %v3445_v19  ;;  %v4018_v63 = vperm.slane %v4014_v38, 2  ;;  %v4019_v30 = vperm.slane %v4014_v38, 3 }
 0x31f   :  { %4504 = vmatpush.bf16.msra.mxu0 %v6951_v45  ;;  %4517 = vmatpush.bf16.msra.mxu1 %v6959_v9 }
 0x320   :  { %v3664_v1 = vmax.f32 %v3646_v62, 0.0  ;;  %v3665_v3 = vmax.f32 %v3659_v0, 0.0 }
 0x322   :  { %v3668_v4 = vpack.c.bf16 %v3664_v1, %v3664_v1  ;;  %v3669_v5 = vpack.c.bf16 %v3665_v3, %v3665_v3  ;;  %4192 = vmatmul.bf16.vlgmr.msrb.gmra.mxu0 %v7247_v54  ;;  %4205 = vmatmul.bf16.vlgmr.msrb.gmra.mxu1 %v7247_v54 }
 0x323   :  { %4505 = vmatpush.bf16.msra.mxu0 %v6950_v10  ;;  %4518 = vmatpush.bf16.msra.mxu1 %v6958_v11 }
 0x324   :  { %3961 = vmatmul.bf16.vlgmr.msra.gmra.mxu2 %v3668_v4  ;;  %3974 = vmatmul.bf16.vlgmr.msra.gmra.mxu3 %v3669_v5 }
 0x325   :  { %v3647_v6 = vpop.f32.mrf.mxu2  ;;  %v3660_v8 = vpop.f32.mrf.mxu3  ;;  %4527 = vmatpush.bf16.msra.mxu2 %v6970_v16  ;;  %v6990_v16 = vld [vmem:[%s7311_s6] ss:$0 sm:$0xff] }
 0x327   :  { %4506 = vmatpush.bf16.msra.mxu0 %v6949_v12  ;;  %4519 = vmatpush.bf16.msra.mxu1 %v6957_v13 }
 0x329   :  { %4528 = vmatpush.bf16.msra.mxu2 %v6969_v22 }
 0x32b   :  { %4507 = vmatpush.bf16.msra.mxu0 %v6948_v14  ;;  %4520 = vmatpush.bf16.msra.mxu1 %v6956_v15 }
 0x32d   :  { %4529 = vmatpush.bf16.msra.mxu2 %v6968_v23 }
 0x32f   :  { %4508 = vmatpush.bf16.msra.mxu0 %v6947_v20  ;;  %4521 = vmatpush.bf16.msra.mxu1 %v6955_v21 }
 0x331   :  { %4530 = vmatpush.bf16.msra.mxu2 %v6967_v25 }
 0x334   :  { %4218 = vmatmul.bf16.vlgmr.msrb.gmra.mxu2 %v7247_v54  ;;  %4231 = vmatmul.bf16.vlgmr.msrb.gmra.mxu3 %v7247_v54  ;;  %v6978_v54 = vld [vmem:[#allocation10 + $0x4f8] sm:$0xff] }
 0x335   :  { %4540 = vmatpush.bf16.msra.mxu3 %v6978_v54  ;;  %4531 = vmatpush.bf16.msra.mxu2 %v6966_v2 }
 0x339   :  { %4541 = vmatpush.bf16.msra.mxu3 %v6977_v49  ;;  %4532 = vmatpush.bf16.msra.mxu2 %v6965_v17 }
 0x33d   :  { %4542 = vmatpush.bf16.msra.mxu3 %v6976_v24  ;;  %4533 = vmatpush.bf16.msra.mxu2 %v6964_v33 }
 0x341   :  { %4543 = vmatpush.bf16.msra.mxu3 %v6975_v26  ;;  %4534 = vmatpush.bf16.msra.mxu2 %v6963_v39 }
 0x345   :  { %4544 = vmatpush.bf16.msra.mxu3 %v6974_v27 }
 0x349   :  { %4545 = vmatpush.bf16.msra.mxu3 %v6973_v18 }
 0x34d   :  { %4546 = vmatpush.bf16.msra.mxu3 %v6972_v34 }
 0x351   :  { %4547 = vmatpush.bf16.msra.mxu3 %v6971_v40 }
 0x38f   :  { %v3936_v28 = vpop.f32.mrf.mxu0  ;;  %v3949_v31 = vpop.f32.mrf.mxu1 }
 0x390   :  { %v3950_v32 = vadd.f32 %v3949_v31, %v3936_v28 }
 0x397   :  { %v3938_v36 = vpop.f32.mrf.mxu0  ;;  %v3951_v37 = vpop.f32.mrf.mxu1 }
 0x39f   :  { %v4193_v43 = vpop.f32.mrf.mxu0  ;;  %v4206_v44 = vpop.f32.mrf.mxu1 }
 0x3a0   :  { %v4194_v46 = vadd.f32 %v4193_v43, %v4016_v41  ;;  %v4207_v47 = vadd.f32 %v4206_v44, %v4017_v42 }
 0x3a2   :  { %v4236_v48 = vmax.f32 %v4194_v46, 0.0  ;;  %v4237_v50 = vmax.f32 %v4207_v47, 0.0 }
 0x3a4   :  { %v4240_v7 = vpack.c.bf16 %v4236_v48, %v4236_v48  ;;  %v4241_v52 = vpack.c.bf16 %v4237_v50, %v4237_v50 }
 0x3a6   :  { %4509 = vmatmul.bf16.vlgmr.msra.gmra.mxu0 %v4240_v7  ;;  %4522 = vmatmul.bf16.vlgmr.msra.gmra.mxu1 %v4241_v52 }
 0x3a7   :  { %v3962_v53 = vpop.f32.mrf.mxu2  ;;  %v3975_v55 = vpop.f32.mrf.mxu3 }
 0x3a8   :  { %v3963_v56 = vadd.f32 %v3962_v53, %v3950_v32  ;;  %v4195_v58 = vpop.f32.mrf.mxu0  ;;  %v4208_v59 = vpop.f32.mrf.mxu1 }
 0x3aa   :  { %v3976_v60 = vadd.f32 %v3975_v55, %v3963_v56 }
 0x3ac   :  { %v3979_v57 = vadd.f32 %v3976_v60, %v7290_v51 }
 0x3af   :  { %v3964_v61 = vpop.f32.mrf.mxu2  ;;  %v3977_v19 = vpop.f32.mrf.mxu3 }
 0x3b7   :  { %v4219_v62 = vpop.f32.mrf.mxu2  ;;  %v4232_v0 = vpop.f32.mrf.mxu3 }
 0x3b8   :  { %v4220_v1 = vadd.f32 %v4219_v62, %v4018_v63  ;;  %v4233_v3 = vadd.f32 %v4232_v0, %v4019_v30 }
 0x3ba   :  { %v4238_v4 = vmax.f32 %v4220_v1, 0.0  ;;  %v4239_v5 = vmax.f32 %v4233_v3, 0.0 }
 0x3bc   :  { %v4242_v6 = vpack.c.bf16 %v4238_v4, %v4238_v4  ;;  %v4243_v8 = vpack.c.bf16 %v4239_v5, %v4239_v5 }
 0x3be   :  { %4535 = vmatmul.bf16.vlgmr.msra.gmra.mxu2 %v4242_v6  ;;  %4548 = vmatmul.bf16.vlgmr.msra.gmra.mxu3 %v4243_v8 }
 0x3bf   :  { %v4221_v35 = vpop.f32.mrf.mxu2  ;;  %v4234_v29 = vpop.f32.mrf.mxu3 }
 0x423   :  { %v4510_v45 = vpop.f32.mrf.mxu0  ;;  %v4523_v9 = vpop.f32.mrf.mxu1 }
 0x424   :  { %v4524_v11 = vadd.f32 %v4523_v9, %v4510_v45 }
 0x42b   :  { %v4512_v10 = vpop.f32.mrf.mxu0  ;;  %v4525_v51 = vpop.f32.mrf.mxu1 }
 0x441   :  { %v4536_v12 = vpop.f32.mrf.mxu2  ;;  %v4549_v13 = vpop.f32.mrf.mxu3 }
 0x442   :  { %v4537_v14 = vadd.f32 %v4536_v12, %v4524_v11 }
 0x444   :  { %v4550_v15 = vadd.f32 %v4549_v13, %v4537_v14 }
 0x446   :  { %v4553_v54 = vadd.f32 %v4550_v15, %v3979_v57 }
 0x448   :  { %v4558_v20 = vadd.f32 %v6990_v16, %v4553_v54 }
 0x449   :  { %v4538_v21 = vpop.f32.mrf.mxu2  ;;  %v4551_v22 = vpop.f32.mrf.mxu3 }
 0x44a   :  { %4559 = vst [vmem:[#allocation11] sm:$0xff] %v4558_v20 }
 0x44b   :  { %4570 = dma.vmem_to_hbm [thread:$0]  %s4566_s29, 128, %s4568_s9, [#allocation4]  }
 0x44c   :  { %7141 = dma.done.wait [#allocation4], 128  }
 0x44d   :  { %7142 = vsyncadd [#allocation4], 4294967168 }
 0x44e   :  { %4575 = vsyncpa [#allocation3], 1 }
 0x44f   :  { %4576 = vsyncpa [#allocation6], 1 }
 0x450   :  { %4577 = vsyncpa [#allocation9], 1 }
 0x451   :  { %4578 = vsyncpa [#allocation4], 1 }

</bundles_post_ra>
